<compile_context>
chip_gen: v7x
topology: tpu7x:2x2x1
jax: 0.10.0
libtpu: 0.0.40
codegen_flags: <defaults>
</compile_context>

<pallas_src>
import functools

import jax
import jax.numpy as jnp
from jax.experimental import pallas as pl
from jax.experimental.pallas import tpu as pltpu

IN_DIM = 28 * 28      # 784
HIDDEN = 500
LATENT = 2

IN_PAD = 896          # 7 * 128  (lane-dense decoder output slab)
HID_PAD = 512         # 4 * 128
LAT_PAD = 128         # 1 * 128

TB_MAX = 128          # batch tile (multiple of 8); small enough for v5e/v7x VMEM budgets


def _round_up(x, m):
    return (x + m - 1) // m * m


# ----------------------------- fused VAE forward kernel -----------------------------
def vae_fwd_kernel(x_ref, eps_ref,
                   w1_ref, b1_ref,
                   wmu_ref, bmu_ref,
                   wsg_ref, bsg_ref,
                   wd1_ref, bd1_ref,
                   wd2_ref, bd2_ref,
                   o_ref):
    # x_ref:   (TB, 784)  f32      eps_ref: (TB, 128) f32 (zero-padded past LATENT)
    # w*_ref:  bf16 weights, pre-transposed & zero-padded (padding contributes 0)
    # b*_ref:  (1, N) f32 biases
    # o_ref:   (TB, 896)  f32 (sigmoid output; columns >= 784 are junk, sliced off outside)

    # ---- encode ----
    xb = x_ref[...].astype(jnp.bfloat16)
    h = jnp.dot(xb, w1_ref[...], preferred_element_type=jnp.float32) + b1_ref[...]
    h = jnp.maximum(h, 0.0).astype(jnp.bfloat16)                       # ReLU
    mu = jnp.dot(h, wmu_ref[...], preferred_element_type=jnp.float32) + bmu_ref[...]
    sg = jnp.dot(h, wsg_ref[...], preferred_element_type=jnp.float32) + bsg_ref[...]

    # ---- reparameterization:  z = mu + sigma * eps ----
    z = (mu + sg * eps_ref[...]).astype(jnp.bfloat16)

    # ---- decode ----
    hd = jnp.dot(z, wd1_ref[...], preferred_element_type=jnp.float32) + bd1_ref[...]
    hd = jnp.maximum(hd, 0.0).astype(jnp.bfloat16)                     # ReLU
    rec = jnp.dot(hd, wd2_ref[...], preferred_element_type=jnp.float32) + bd2_ref[...]
    o_ref[...] = jax.nn.sigmoid(rec)                                   # Sigmoid


# ----------------------------- wrapper -----------------------------
@jax.jit
def vae_forward(x, eps, prepared):
    """x: (B, 1, 28, 28) or (B, 28, 28); eps: (B, LATENT). Returns (B, 784) f32."""
    (w1p, b1p, wmup, bmup, wsgp, bsgp, wd1p, bd1p, wd2p, bd2p) = prepared

    B = x.shape[0]
    x_flat = x.reshape(B, -1).astype(jnp.float32)         # nn.Flatten(start_dim=1)

    tb = min(TB_MAX, _round_up(B, 8))                     # batch tile (>= 8, mult of 8)
    bp = _round_up(B, tb)                                 # padded batch
    x_pad = jnp.pad(x_flat, ((0, bp - B), (0, 0)))
    eps_pad = jnp.zeros((bp, LAT_PAD), jnp.float32).at[:B, :LATENT].set(
        eps.astype(jnp.float32))

    def wspec(shape):                                     # whole weight resident in VMEM
        return pl.BlockSpec(shape, lambda i: (0, 0))

    out = pl.pallas_call(
        vae_fwd_kernel,
        out_shape=jax.ShapeDtypeStruct((bp, IN_PAD), jnp.float32),
        grid_spec=pltpu.PrefetchScalarGridSpec(
            num_scalar_prefetch=0,
            grid=(bp // tb,),
            in_specs=[
                pl.BlockSpec((tb, IN_DIM), lambda i: (i, 0)),    # x tile
                pl.BlockSpec((tb, LAT_PAD), lambda i: (i, 0)),   # eps tile
                wspec((IN_DIM, HID_PAD)), wspec((1, HID_PAD)),   # img_to_hidden
                wspec((HID_PAD, LAT_PAD)), wspec((1, LAT_PAD)),  # hidden_to_mu
                wspec((HID_PAD, LAT_PAD)), wspec((1, LAT_PAD)),  # hidden_to_sigma
                wspec((LAT_PAD, HID_PAD)), wspec((1, HID_PAD)),  # latent_to_hidden
                wspec((HID_PAD, IN_PAD)), wspec((1, IN_PAD)),    # hidden_to_rec_img
            ],
            out_specs=pl.BlockSpec((tb, IN_PAD), lambda i: (i, 0)),
        ),
        compiler_params=pltpu.CompilerParams(
            dimension_semantics=("parallel",),                   # megacore over batch tiles
            vmem_limit_bytes=32 * 1024 * 1024,                   # explicit, fits v5e/v6e/v7x
        ),
    )(x_pad, eps_pad, w1p, b1p, wmup, bmup, wsgp, bsgp, wd1p, bd1p, wd2p, bd2p)

    return out[:B, :IN_DIM]                                      # drop batch/lane padding


# ----------------------------- params -----------------------------
def init_params(key):
    """PyTorch-default Linear init: U(-1/sqrt(fan_in), 1/sqrt(fan_in))."""
    ks = jax.random.split(key, 10)

    def linear(kw, kb, out_f, in_f):
        bound = 1.0 / (in_f ** 0.5)
        w = jax.random.uniform(kw, (out_f, in_f), jnp.float32, -bound, bound)
        b = jax.random.uniform(kb, (out_f,), jnp.float32, -bound, bound)
        return w, b

    w1, b1 = linear(ks[0], ks[1], HIDDEN, IN_DIM)     # img_to_hidden
    wmu, bmu = linear(ks[2], ks[3], LATENT, HIDDEN)   # hidden_to_mu
    wsg, bsg = linear(ks[4], ks[5], LATENT, HIDDEN)   # hidden_to_sigma
    wd1, bd1 = linear(ks[6], ks[7], HIDDEN, LATENT)   # latent_to_hidden
    wd2, bd2 = linear(ks[8], ks[9], IN_DIM, HIDDEN)   # hidden_to_rec_img
    return (w1, b1, wmu, bmu, wsg, bsg, wd1, bd1, wd2, bd2)


def prepare_params(params):
    """One-time layout prep (outside the per-step path): transpose, zero-pad to
    lane-dense shapes, cast weights to bf16 (f32 biases / accumulation)."""
    (w1, b1, wmu, bmu, wsg, bsg, wd1, bd1, wd2, bd2) = params

    def pad2(a, shape):
        return jnp.zeros(shape, a.dtype).at[:a.shape[0], :a.shape[1]].set(a)

    w1p = pad2(w1.T, (IN_DIM, HID_PAD)).astype(jnp.bfloat16)
    b1p = pad2(b1.reshape(1, -1), (1, HID_PAD)).astype(jnp.float32)
    wmup = pad2(wmu.T, (HID_PAD, LAT_PAD)).astype(jnp.bfloat16)
    bmup = pad2(bmu.reshape(1, -1), (1, LAT_PAD)).astype(jnp.float32)
    wsgp = pad2(wsg.T, (HID_PAD, LAT_PAD)).astype(jnp.bfloat16)
    bsgp = pad2(bsg.reshape(1, -1), (1, LAT_PAD)).astype(jnp.float32)
    wd1p = pad2(wd1.T, (LAT_PAD, HID_PAD)).astype(jnp.bfloat16)
    bd1p = pad2(bd1.reshape(1, -1), (1, HID_PAD)).astype(jnp.float32)
    wd2p = pad2(wd2.T, (HID_PAD, IN_PAD)).astype(jnp.bfloat16)
    bd2p = pad2(bd2.reshape(1, -1), (1, IN_PAD)).astype(jnp.float32)
    return (w1p, b1p, wmup, bmup, wsgp, bsgp, wd1p, bd1p, wd2p, bd2p)


# ----------------------------- reference (mirrors kernel dtype choices) -----------------------------
def ref_forward(x, eps, params):
    (w1, b1, wmu, bmu, wsg, bsg, wd1, bd1, wd2, bd2) = params
    bf = lambda a: a.astype(jnp.bfloat16)
    xf = x.reshape(x.shape[0], -1).astype(jnp.float32)
    h = jnp.dot(bf(xf), bf(w1).T, preferred_element_type=jnp.float32) + b1
    h = jnp.maximum(h, 0.0)
    mu = jnp.dot(bf(h), bf(wmu).T, preferred_element_type=jnp.float32) + bmu
    sg = jnp.dot(bf(h), bf(wsg).T, preferred_element_type=jnp.float32) + bsg
    z = mu + sg * eps
    hd = jnp.dot(bf(z), bf(wd1).T, preferred_element_type=jnp.float32) + bd1
    hd = jnp.maximum(hd, 0.0)
    rec = jnp.dot(bf(hd), bf(wd2).T, preferred_element_type=jnp.float32) + bd2
    return jax.nn.sigmoid(rec)


if __name__ == "__main__":
    key = jax.random.PRNGKey(0)
    k_x, k_p, k_eps = jax.random.split(key, 3)

    x = jax.random.normal(k_x, (2, 1, 28, 28), jnp.float32)   # MNIST-style NCHW input
    params = init_params(k_p)
    prepared = prepare_params(params)                         # one-time layout prep
    # torch.randn_like(sigma) -> deterministic JAX eps passed into the kernel
    eps = jax.random.normal(k_eps, (2, LATENT), jnp.float32)

    out = vae_forward(x, eps, prepared)
    jax.block_until_ready(out)
    assert out.shape == (2, IN_DIM) and out.dtype == jnp.float32

    ref = ref_forward(x, eps, params)
    assert jnp.allclose(out, ref, atol=2e-3, rtol=2e-3), float(jnp.max(jnp.abs(out - ref)))

    print("KERNEL_OK")
</pallas_src>

<mosaic_0001>
module attributes {stable_mosaic.version = 11 : i64} {
  func.func @vae_fwd_kernel(%arg0: i32, %arg1: memref<8x784xf32, #tpu.memory_space<vmem>>, %arg2: memref<8x128xf32, #tpu.memory_space<vmem>>, %arg3: memref<784x512xbf16, #tpu.memory_space<vmem>>, %arg4: memref<1x512xf32, #tpu.memory_space<vmem>>, %arg5: memref<512x128xbf16, #tpu.memory_space<vmem>>, %arg6: memref<1x128xf32, #tpu.memory_space<vmem>>, %arg7: memref<512x128xbf16, #tpu.memory_space<vmem>>, %arg8: memref<1x128xf32, #tpu.memory_space<vmem>>, %arg9: memref<128x512xbf16, #tpu.memory_space<vmem>>, %arg10: memref<1x512xf32, #tpu.memory_space<vmem>>, %arg11: memref<512x896xbf16, #tpu.memory_space<vmem>>, %arg12: memref<1x896xf32, #tpu.memory_space<vmem>>, %arg13: memref<8x896xf32, #tpu.memory_space<vmem>>) attributes {dimension_semantics = [#tpu.dimension_semantics<parallel>], iteration_bounds = array<i64: 1>, scalar_prefetch = 0 : i64, scratch_operands = 0 : i64, tpu.core_type = #tpu.core_type<tc>, window_params = [{transform_indices = @transform_0, window_bounds = array<i64: 8, 784>}, {transform_indices = @transform_1, window_bounds = array<i64: 8, 128>}, {pipeline_mode = #tpu.pipeline_mode<synchronous>, transform_indices = @transform_2, window_bounds = array<i64: 784, 512>}, {pipeline_mode = #tpu.pipeline_mode<synchronous>, transform_indices = @transform_3, window_bounds = array<i64: 1, 512>}, {pipeline_mode = #tpu.pipeline_mode<synchronous>, transform_indices = @transform_4, window_bounds = array<i64: 512, 128>}, {pipeline_mode = #tpu.pipeline_mode<synchronous>, transform_indices = @transform_5, window_bounds = array<i64: 1, 128>}, {pipeline_mode = #tpu.pipeline_mode<synchronous>, transform_indices = @transform_6, window_bounds = array<i64: 512, 128>}, {pipeline_mode = #tpu.pipeline_mode<synchronous>, transform_indices = @transform_7, window_bounds = array<i64: 1, 128>}, {pipeline_mode = #tpu.pipeline_mode<synchronous>, transform_indices = @transform_8, window_bounds = array<i64: 128, 512>}, {pipeline_mode = #tpu.pipeline_mode<synchronous>, transform_indices = @transform_9, window_bounds = array<i64: 1, 512>}, {pipeline_mode = #tpu.pipeline_mode<synchronous>, transform_indices = @transform_10, window_bounds = array<i64: 512, 896>}, {pipeline_mode = #tpu.pipeline_mode<synchronous>, transform_indices = @transform_11, window_bounds = array<i64: 1, 896>}, {transform_indices = @transform_12, window_bounds = array<i64: 8, 896>}]} {
    %c0 = arith.constant 0 : index
    %c0_0 = arith.constant 0 : index
    %0 = vector.load %arg1[%c0, %c0_0] : memref<8x784xf32, #tpu.memory_space<vmem>>, vector<8x784xf32>
    %1 = arith.truncf %0 : vector<8x784xf32> to vector<8x784xbf16>
    %c0_1 = arith.constant 0 : index
    %c0_2 = arith.constant 0 : index
    %2 = vector.load %arg3[%c0_1, %c0_2] : memref<784x512xbf16, #tpu.memory_space<vmem>>, vector<784x512xbf16>
    %cst = arith.constant dense<0.000000e+00> : vector<8x512xf32>
    %3 = tpu.matmul %1, %2, %cst {dimension_numbers = #tpu.dot_dimension_numbers<[1], [0], [0], [1], [0, 0, 1, 1], [], []>} : vector<8x784xbf16>, vector<784x512xbf16>, vector<8x512xf32> -> vector<8x512xf32>
    %c0_3 = arith.constant 0 : index
    %c0_4 = arith.constant 0 : index
    %4 = vector.load %arg4[%c0_3, %c0_4] : memref<1x512xf32, #tpu.memory_space<vmem>>, vector<1x512xf32>
    %5 = vector.broadcast %4 : vector<1x512xf32> to vector<8x512xf32>
    %6 = arith.addf %3, %5 : vector<8x512xf32>
    %cst_5 = arith.constant 0.000000e+00 : f32
    %7 = vector.broadcast %cst_5 : f32 to vector<8x512xf32>
    %8 = arith.maximumf %6, %7 : vector<8x512xf32>
    %9 = arith.truncf %8 : vector<8x512xf32> to vector<8x512xbf16>
    %c0_6 = arith.constant 0 : index
    %c0_7 = arith.constant 0 : index
    %10 = vector.load %arg5[%c0_6, %c0_7] : memref<512x128xbf16, #tpu.memory_space<vmem>>, vector<512x128xbf16>
    %cst_8 = arith.constant dense<0.000000e+00> : vector<8x128xf32>
    %11 = tpu.matmul %9, %10, %cst_8 {dimension_numbers = #tpu.dot_dimension_numbers<[1], [0], [0], [1], [0, 0, 1, 1], [], []>} : vector<8x512xbf16>, vector<512x128xbf16>, vector<8x128xf32> -> vector<8x128xf32>
    %c0_9 = arith.constant 0 : index
    %c0_10 = arith.constant 0 : index
    %12 = vector.load %arg6[%c0_9, %c0_10] : memref<1x128xf32, #tpu.memory_space<vmem>>, vector<1x128xf32>
    %13 = vector.broadcast %12 : vector<1x128xf32> to vector<8x128xf32>
    %14 = arith.addf %11, %13 : vector<8x128xf32>
    %c0_11 = arith.constant 0 : index
    %c0_12 = arith.constant 0 : index
    %15 = vector.load %arg7[%c0_11, %c0_12] : memref<512x128xbf16, #tpu.memory_space<vmem>>, vector<512x128xbf16>
    %cst_13 = arith.constant dense<0.000000e+00> : vector<8x128xf32>
    %16 = tpu.matmul %9, %15, %cst_13 {dimension_numbers = #tpu.dot_dimension_numbers<[1], [0], [0], [1], [0, 0, 1, 1], [], []>} : vector<8x512xbf16>, vector<512x128xbf16>, vector<8x128xf32> -> vector<8x128xf32>
    %c0_14 = arith.constant 0 : index
    %c0_15 = arith.constant 0 : index
    %17 = vector.load %arg8[%c0_14, %c0_15] : memref<1x128xf32, #tpu.memory_space<vmem>>, vector<1x128xf32>
    %18 = vector.broadcast %17 : vector<1x128xf32> to vector<8x128xf32>
    %19 = arith.addf %16, %18 : vector<8x128xf32>
    %c0_16 = arith.constant 0 : index
    %c0_17 = arith.constant 0 : index
    %20 = vector.load %arg2[%c0_16, %c0_17] : memref<8x128xf32, #tpu.memory_space<vmem>>, vector<8x128xf32>
    %21 = arith.mulf %19, %20 : vector<8x128xf32>
    %22 = arith.addf %14, %21 : vector<8x128xf32>
    %23 = arith.truncf %22 : vector<8x128xf32> to vector<8x128xbf16>
    %c0_18 = arith.constant 0 : index
    %c0_19 = arith.constant 0 : index
    %24 = vector.load %arg9[%c0_18, %c0_19] : memref<128x512xbf16, #tpu.memory_space<vmem>>, vector<128x512xbf16>
    %cst_20 = arith.constant dense<0.000000e+00> : vector<8x512xf32>
    %25 = tpu.matmul %23, %24, %cst_20 {dimension_numbers = #tpu.dot_dimension_numbers<[1], [0], [0], [1], [0, 0, 1, 1], [], []>} : vector<8x128xbf16>, vector<128x512xbf16>, vector<8x512xf32> -> vector<8x512xf32>
    %c0_21 = arith.constant 0 : index
    %c0_22 = arith.constant 0 : index
    %26 = vector.load %arg10[%c0_21, %c0_22] : memref<1x512xf32, #tpu.memory_space<vmem>>, vector<1x512xf32>
    %27 = vector.broadcast %26 : vector<1x512xf32> to vector<8x512xf32>
    %28 = arith.addf %25, %27 : vector<8x512xf32>
    %cst_23 = arith.constant 0.000000e+00 : f32
    %29 = vector.broadcast %cst_23 : f32 to vector<8x512xf32>
    %30 = arith.maximumf %28, %29 : vector<8x512xf32>
    %31 = arith.truncf %30 : vector<8x512xf32> to vector<8x512xbf16>
    %c0_24 = arith.constant 0 : index
    %c0_25 = arith.constant 0 : index
    %32 = vector.load %arg11[%c0_24, %c0_25] : memref<512x896xbf16, #tpu.memory_space<vmem>>, vector<512x896xbf16>
    %cst_26 = arith.constant dense<0.000000e+00> : vector<8x896xf32>
    %33 = tpu.matmul %31, %32, %cst_26 {dimension_numbers = #tpu.dot_dimension_numbers<[1], [0], [0], [1], [0, 0, 1, 1], [], []>} : vector<8x512xbf16>, vector<512x896xbf16>, vector<8x896xf32> -> vector<8x896xf32>
    %c0_27 = arith.constant 0 : index
    %c0_28 = arith.constant 0 : index
    %34 = vector.load %arg12[%c0_27, %c0_28] : memref<1x896xf32, #tpu.memory_space<vmem>>, vector<1x896xf32>
    %35 = vector.broadcast %34 : vector<1x896xf32> to vector<8x896xf32>
    %36 = arith.addf %33, %35 : vector<8x896xf32>
    %37 = arith.negf %36 : vector<8x896xf32>
    %38 = math.exp %37 : vector<8x896xf32>
    %cst_29 = arith.constant 1.000000e+00 : f32
    %39 = vector.broadcast %cst_29 : f32 to vector<8x896xf32>
    %40 = arith.addf %39, %38 : vector<8x896xf32>
    %41 = arith.divf %39, %40 : vector<8x896xf32>
    %c0_30 = arith.constant 0 : index
    %c0_31 = arith.constant 0 : index
    %42 = vector.load %arg13[%c0_30, %c0_31] : memref<8x896xf32, #tpu.memory_space<vmem>>, vector<8x896xf32>
    tpu.vector_store %arg13[%c0_30, %c0_31], %41 {strides = array<i32>} : memref<8x896xf32, #tpu.memory_space<vmem>>, vector<8x896xf32>,
    return
  }
  func.func @transform_0(%arg0: i32) -> (i32, i32) {
    %c0_i32 = arith.constant 0 : i32
    %c0_i32_0 = arith.constant 0 : i32
    return %arg0, %c0_i32 : i32, i32
  }
  func.func @transform_1(%arg0: i32) -> (i32, i32) {
    %c0_i32 = arith.constant 0 : i32
    %c0_i32_0 = arith.constant 0 : i32
    return %arg0, %c0_i32 : i32, i32
  }
  func.func @transform_2(%arg0: i32) -> (i32, i32) {
    %c0_i32 = arith.constant 0 : i32
    %c0_i32_0 = arith.constant 0 : i32
    %c0_i32_1 = arith.constant 0 : i32
    return %c0_i32, %c0_i32_0 : i32, i32
  }
  func.func @transform_3(%arg0: i32) -> (i32, i32) {
    %c0_i32 = arith.constant 0 : i32
    %c0_i32_0 = arith.constant 0 : i32
    %c0_i32_1 = arith.constant 0 : i32
    return %c0_i32, %c0_i32_0 : i32, i32
  }
  func.func @transform_4(%arg0: i32) -> (i32, i32) {
    %c0_i32 = arith.constant 0 : i32
    %c0_i32_0 = arith.constant 0 : i32
    %c0_i32_1 = arith.constant 0 : i32
    return %c0_i32, %c0_i32_0 : i32, i32
  }
  func.func @transform_5(%arg0: i32) -> (i32, i32) {
    %c0_i32 = arith.constant 0 : i32
    %c0_i32_0 = arith.constant 0 : i32
    %c0_i32_1 = arith.constant 0 : i32
    return %c0_i32, %c0_i32_0 : i32, i32
  }
  func.func @transform_6(%arg0: i32) -> (i32, i32) {
    %c0_i32 = arith.constant 0 : i32
    %c0_i32_0 = arith.constant 0 : i32
    %c0_i32_1 = arith.constant 0 : i32
    return %c0_i32, %c0_i32_0 : i32, i32
  }
  func.func @transform_7(%arg0: i32) -> (i32, i32) {
    %c0_i32 = arith.constant 0 : i32
    %c0_i32_0 = arith.constant 0 : i32
    %c0_i32_1 = arith.constant 0 : i32
    return %c0_i32, %c0_i32_0 : i32, i32
  }
  func.func @transform_8(%arg0: i32) -> (i32, i32) {
    %c0_i32 = arith.constant 0 : i32
    %c0_i32_0 = arith.constant 0 : i32
    %c0_i32_1 = arith.constant 0 : i32
    return %c0_i32, %c0_i32_0 : i32, i32
  }
  func.func @transform_9(%arg0: i32) -> (i32, i32) {
    %c0_i32 = arith.constant 0 : i32
    %c0_i32_0 = arith.constant 0 : i32
    %c0_i32_1 = arith.constant 0 : i32
    return %c0_i32, %c0_i32_0 : i32, i32
  }
  func.func @transform_10(%arg0: i32) -> (i32, i32) {
    %c0_i32 = arith.constant 0 : i32
    %c0_i32_0 = arith.constant 0 : i32
    %c0_i32_1 = arith.constant 0 : i32
    return %c0_i32, %c0_i32_0 : i32, i32
  }
  func.func @transform_11(%arg0: i32) -> (i32, i32) {
    %c0_i32 = arith.constant 0 : i32
    %c0_i32_0 = arith.constant 0 : i32
    %c0_i32_1 = arith.constant 0 : i32
    return %c0_i32, %c0_i32_0 : i32, i32
  }
  func.func @transform_12(%arg0: i32) -> (i32, i32) {
    %c0_i32 = arith.constant 0 : i32
    %c0_i32_0 = arith.constant 0 : i32
    return %arg0, %c0_i32 : i32, i32
  }
}

</mosaic_0001>

<bundles_post_ra>
// kernel: vae_forward.1
= control target key start
LH: loop header
LB: loop body
LE: loop exit
PB: predicated region body
PF: predicated region fallthrough
CT: control target
= control target key end

     0   :  { %17 = vsyncpa [#allocation3], 0  ;;  %s6396_s0 = inlined_call_operand.vmem [shape: f32[8,784], index: 0, kind: input, shape index: {}]   ;;  %s6397_s1 = inlined_call_operand.vmem [shape: f32[8,128], index: 1, kind: input, shape index: {}]   ;;  %s6398_s2 = inlined_call_operand.hbm [shape: bf16[784,512], index: 2, kind: input, shape index: {}]   ;;  %s6399_s3 = inlined_call_operand.vmem [shape: f32[1,512], index: 3, kind: input, shape index: {}]   ;;  %s6400_s4 = inlined_call_operand.vmem [shape: bf16[512,128], index: 4, kind: input, shape index: {}]   ;;  %s6401_s5 = inlined_call_operand.vmem [shape: f32[1,128], index: 5, kind: input, shape index: {}]   ;;  %s6402_s6 = inlined_call_operand.hbm [shape: bf16[512,128], index: 6, kind: input, shape index: {}]   ;;  %s6403_s7 = inlined_call_operand.vmem [shape: f32[1,128], index: 7, kind: input, shape index: {}]   ;;  %s6404_s8 = inlined_call_operand.hbm [shape: bf16[128,512], index: 8, kind: input, shape index: {}]   ;;  %s6405_s9 = inlined_call_operand.vmem [shape: f32[1,512], index: 9, kind: input, shape index: {}]   ;;  %s6406_s10 = inlined_call_operand.hbm [shape: bf16[512,896], index: 10, kind: input, shape index: {}]   ;;  %s6407_s11 = inlined_call_operand.vmem [shape: f32[1,896], index: 11, kind: input, shape index: {}]   ;;  %s6408_s12 = inlined_call_operand.vmem [shape: f32[8,896], index: 12, kind: output, shape index: {}]  }
   0x1   :  { %18 = vsyncpa [#allocation5], 0 }
   0x2   :  { %19 = vsyncpa [#allocation8], 0  ;;  %s6034_s21 = smov [#allocation4]   ;;  %s5940_s25 = scalar_lea.hbm %s6402_s6, 4096 }
   0x3   :  { %s47_s22 = sshll.u32 %s6034_s21, 4  ;;  %p5941_p0 = scmp.ne.s32.totalorder %s6402_s6, %s5940_s25  ;;  %s48_s22 = int_to_ptr.vmem [resolvable:$true] %s47_s22 }
   0x4   :  { %p5944_p1 = scmp.lt.u32.totalorder %s5940_s25, %s6402_s6 }
   0x6   :  { %p5946_p2 = pnand %p5944_p1, %p5941_p0 }
   0x8   :  { %5949 = shalt.err (!%p5946_p2)
}
   0x9   :  { %s5950_s30 = scalar_lea.vmem %s48_s22, 4096  ;;  %p5955_p4 = scmp.lt.s32.totalorder %s48_s22, %s48_s22 }
   0xa   :  { %p5951_p3 = scmp.ne.s32.totalorder %s48_s22, %s5950_s30  ;;  %p5956_p5 = scmp.lt.s32.totalorder %s5950_s30, %s5950_s30 }
   0xc   :  { %p5957_p6 = por %p5956_p5, %p5955_p4 }
   0xe   :  { %p5958_p7 = pnand %p5957_p6, %p5951_p3 }
  0x10   :  { %5961 = shalt.err (!%p5958_p7)
}
  0x11   :  { %s6035_s13 = smov 64   ;;  %s6036_s14 = smov 4  }
  0x12   :  { %53 = dma.hbm_to_vmem [thread:$0]  %s6402_s6, 4096, %s48_s22, [#allocation5], %s6035_s13, %s6035_s13, %s6036_s14  }
  0x13   :  { %s6037_s17 = smov [#allocation2]   ;;  %s5962_s21 = scalar_lea.hbm %s6398_s2, 25088 }
  0x14   :  { %s29_s18 = sshll.u32 %s6037_s17, 4  ;;  %p5963_p8 = scmp.ne.s32.totalorder %s6398_s2, %s5962_s21  ;;  %s30_s18 = int_to_ptr.vmem [resolvable:$true] %s29_s18 }
  0x15   :  { %p5966_p9 = scmp.lt.u32.totalorder %s5962_s21, %s6398_s2 }
  0x17   :  { %p5968_p10 = pnand %p5966_p9, %p5963_p8 }
  0x19   :  { %5971 = shalt.err (!%p5968_p10)
}
  0x1a   :  { %s5972_s27 = scalar_lea.vmem %s30_s18, 25088  ;;  %p5977_p12 = scmp.lt.s32.totalorder %s30_s18, %s30_s18 }
  0x1b   :  { %p5973_p11 = scmp.ne.s32.totalorder %s30_s18, %s5972_s27  ;;  %p5978_p13 = scmp.lt.s32.totalorder %s5972_s27, %s5972_s27 }
  0x1d   :  { %p5979_p0 = por %p5978_p13, %p5977_p12 }
  0x1f   :  { %p5980_p1 = pnand %p5979_p0, %p5973_p11 }
  0x21   :  { %5983 = shalt.err (!%p5980_p1)
}
  0x22   :  { %s6038_s6 = smov 256   ;;  %s6039_s22 = smov 16  }
  0x23   :  { %35 = dma.hbm_to_vmem [thread:$0]  %s6398_s2, 25088, %s30_s18, [#allocation3], %s6038_s6, %s6038_s6, %s6039_s22  }
  0x24   :  { %s6040_s30 = smov [#allocation6]   ;;  %s6041_s14 = smov [#allocation7]  }
  0x25   :  { %s61_s13 = sshll.u32 %s6040_s30, 4  ;;  %s75_s15 = sshll.u32 %s6041_s14, 4  ;;  %s62_s13 = int_to_ptr.vmem [resolvable:$true] %s61_s13  ;;  %s6134_s15 = int_to_ptr.vmem [resolvable:$true] %s75_s15 }
  0x26   :  { %s5984_s19 = scalar_lea.hbm %s6404_s8, 4096 }
  0x27   :  { %p5985_p2 = scmp.ne.s32.totalorder %s6404_s8, %s5984_s19  ;;  %p5988_p3 = scmp.lt.u32.totalorder %s5984_s19, %s6404_s8 }
  0x29   :  { %p5990_p4 = pnand %p5988_p3, %p5985_p2 }
  0x2b   :  { %5993 = shalt.err (!%p5990_p4)
}
  0x2c   :  { %s5994_s2 = scalar_lea.vmem %s62_s13, 4096  ;;  %p5999_p6 = scmp.lt.s32.totalorder %s62_s13, %s62_s13 }
  0x2d   :  { %p5995_p5 = scmp.ne.s32.totalorder %s62_s13, %s5994_s2  ;;  %p6000_p7 = scmp.lt.s32.totalorder %s5994_s2, %s5994_s2 }
  0x2f   :  { %p6001_p8 = por %p6000_p7, %p5999_p6 }
  0x31   :  { %p6002_p9 = pnand %p6001_p8, %p5995_p5 }
  0x33   :  { %6005 = shalt.err (!%p6002_p9)
}
  0x34   :  { %67 = dma.hbm_to_vmem [thread:$0]  %s6404_s8, 4096, %s62_s13, [#allocation5], %s6038_s6, %s6038_s6, %s6039_s22  }
  0x35   :  { %s6006_s28 = scalar_lea.hbm %s6406_s10, 28672 }
  0x36   :  { %p6007_p10 = scmp.ne.s32.totalorder %s6406_s10, %s6006_s28  ;;  %p6010_p11 = scmp.lt.u32.totalorder %s6006_s28, %s6406_s10 }
  0x38   :  { %p6012_p12 = pnand %p6010_p11, %p6007_p10 }
  0x3a   :  { %6015 = shalt.err (!%p6012_p12)
}
  0x3b   :  { %s6016_s17 = scalar_lea.vmem %s6134_s15, 28672  ;;  %p6021_p0 = scmp.lt.s32.totalorder %s6134_s15, %s6134_s15 }
  0x3c   :  { %p6017_p13 = scmp.ne.s32.totalorder %s6134_s15, %s6016_s17  ;;  %p6022_p1 = scmp.lt.s32.totalorder %s6016_s17, %s6016_s17 }
  0x3e   :  { %p6023_p2 = por %p6022_p1, %p6021_p0 }
  0x40   :  { %p6024_p3 = pnand %p6023_p2, %p6017_p13 }
  0x42   :  { %6027 = shalt.err (!%p6024_p3)
}
  0x43   :  { %s6042_s8 = smov 448   ;;  %s6043_s6 = smov 28  }
  0x44   :  { %81 = dma.hbm_to_vmem [thread:$0]  %s6406_s10, 28672, %s6134_s15, [#allocation8], %s6042_s8, %s6042_s8, %s6043_s6  }
  0x45   :  { %6028 = dma.done.wait [#allocation3], 25088  }
  0x46   :  { %6029 = vsyncadd [#allocation3], 4294942208 }
  0x47   :  { %6030 = dma.done.wait [#allocation5], 8192  }
  0x48   :  { %6031 = vsyncadd [#allocation5], 4294959104 }
  0x49   :  { %6032 = dma.done.wait [#allocation8], 28672  }
  0x4a   :  { %6033 = vsyncadd [#allocation8], 4294938624  ;;  %v5186_v0 = vld [vmem:[#allocation2 + $0x4] ss:$16 sps:$4 sm:$0xff]   ;;  %v5188_v1 = vld [vmem:[#allocation2 + $0xc] ss:$16 sps:$4 sm:$0xff]  }
  0x4b   :  { %1313 = vmatprep.subr.bf16.mxu0 %v5186_v0  ;;  %v5190_v2 = vld [vmem:[#allocation2] ss:$16 sps:$4 sm:$0xff]   ;;  %v5191_v3 = vld [vmem:[#allocation2 + $0x8] ss:$16 sps:$4 sm:$0xff]   ;;  %1477 = vmatprep.subr.bf16.mxu1 %v5188_v1  ;;  %v5192_v4 = vld [vmem:[#allocation2 + $0x24] ss:$16 sps:$4 sm:$0xff]  }
  0x4c   :  { %1314 = vmatpush1.bf16.msra.mxu0 %v5190_v2  ;;  %1478 = vmatpush1.bf16.msra.mxu1 %v5191_v3  ;;  %v5194_v5 = vld [vmem:[#allocation2 + $0x2c] ss:$16 sps:$4 sm:$0xff]   ;;  %v5196_v6 = vld [vmem:[#allocation2 + $0x20] ss:$16 sps:$4 sm:$0xff]   ;;  %v5197_v7 = vld [vmem:[#allocation2 + $0x28] ss:$16 sps:$4 sm:$0xff]  }
  0x4d   :  { %1315 = vmatprep.subr.bf16.mxu0 %v5192_v4  ;;  %1479 = vmatprep.subr.bf16.mxu1 %v5194_v5  ;;  %v5198_v8 = vld [vmem:[#allocation2 + $0x44] ss:$16 sps:$4 sm:$0xff]   ;;  %v5200_v9 = vld [vmem:[#allocation2 + $0x4c] ss:$16 sps:$4 sm:$0xff]   ;;  %v5202_v10 = vld [vmem:[#allocation2 + $0x40] ss:$16 sps:$4 sm:$0xff]  }
  0x4e   :  { %v5203_v11 = vld [vmem:[#allocation2 + $0x48] ss:$16 sps:$4 sm:$0xff]   ;;  %v5204_v12 = vld [vmem:[#allocation2 + $0x64] ss:$16 sps:$4 sm:$0xff]   ;;  %v5206_v13 = vld [vmem:[#allocation2 + $0x6c] ss:$16 sps:$4 sm:$0xff]  }
  0x4f   :  { %v5208_v14 = vld [vmem:[#allocation2 + $0x60] ss:$16 sps:$4 sm:$0xff]   ;;  %v5209_v15 = vld [vmem:[#allocation2 + $0x68] ss:$16 sps:$4 sm:$0xff]   ;;  %v5210_v16 = vld [vmem:[#allocation2 + $0x84] ss:$16 sps:$4 sm:$0xff]  }
  0x50   :  { %1316 = vmatpush1.bf16.msra.mxu0 %v5196_v6  ;;  %1480 = vmatpush1.bf16.msra.mxu1 %v5197_v7  ;;  %v5212_v17 = vld [vmem:[#allocation2 + $0x8c] ss:$16 sps:$4 sm:$0xff]   ;;  %v5214_v18 = vld [vmem:[#allocation2 + $0x80] ss:$16 sps:$4 sm:$0xff]   ;;  %v5215_v19 = vld [vmem:[#allocation2 + $0x88] ss:$16 sps:$4 sm:$0xff]  }
  0x51   :  { %1317 = vmatprep.subr.bf16.mxu0 %v5198_v8  ;;  %1481 = vmatprep.subr.bf16.mxu1 %v5200_v9  ;;  %v5216_v20 = vld [vmem:[#allocation2 + $0xa4] ss:$16 sps:$4 sm:$0xff]   ;;  %v5218_v21 = vld [vmem:[#allocation2 + $0xac] ss:$16 sps:$4 sm:$0xff]   ;;  %v5220_v22 = vld [vmem:[#allocation2 + $0xa0] ss:$16 sps:$4 sm:$0xff]  }
  0x52   :  { %v5221_v23 = vld [vmem:[#allocation2 + $0xa8] ss:$16 sps:$4 sm:$0xff]   ;;  %v5222_v24 = vld [vmem:[#allocation2 + $0xc4] ss:$16 sps:$4 sm:$0xff]   ;;  %v5224_v25 = vld [vmem:[#allocation2 + $0xcc] ss:$16 sps:$4 sm:$0xff]  }
  0x53   :  { %v5226_v26 = vld [vmem:[#allocation2 + $0xc0] ss:$16 sps:$4 sm:$0xff]   ;;  %v5227_v27 = vld [vmem:[#allocation2 + $0xc8] ss:$16 sps:$4 sm:$0xff]   ;;  %v5228_v28 = vld [vmem:[#allocation2 + $0xe4] ss:$16 sps:$4 sm:$0xff]  }
  0x54   :  { %1318 = vmatpush1.bf16.msra.mxu0 %v5202_v10  ;;  %1482 = vmatpush1.bf16.msra.mxu1 %v5203_v11  ;;  %v5230_v29 = vld [vmem:[#allocation2 + $0xec] ss:$16 sps:$4 sm:$0xff]   ;;  %v5232_v30 = vld [vmem:[#allocation2 + $0xe0] ss:$16 sps:$4 sm:$0xff]   ;;  %v5233_v31 = vld [vmem:[#allocation2 + $0xe8] ss:$16 sps:$4 sm:$0xff]  }
  0x55   :  { %1319 = vmatprep.subr.bf16.mxu0 %v5204_v12  ;;  %1483 = vmatprep.subr.bf16.mxu1 %v5206_v13  ;;  %v5234_v32 = vld [vmem:[#allocation2 + $0x104] ss:$16 sps:$4 sm:$0xff]   ;;  %v5236_v33 = vld [vmem:[#allocation2 + $0x10c] ss:$16 sps:$4 sm:$0xff]   ;;  %v5238_v34 = vld [vmem:[#allocation2 + $0x100] ss:$16 sps:$4 sm:$0xff]  }
  0x56   :  { %v5239_v35 = vld [vmem:[#allocation2 + $0x108] ss:$16 sps:$4 sm:$0xff]   ;;  %v5240_v36 = vld [vmem:[#allocation2 + $0x124] ss:$16 sps:$4 sm:$0xff]   ;;  %v5242_v37 = vld [vmem:[#allocation2 + $0x12c] ss:$16 sps:$4 sm:$0xff]  }
  0x57   :  { %v5244_v38 = vld [vmem:[#allocation2 + $0x120] ss:$16 sps:$4 sm:$0xff]   ;;  %v5245_v39 = vld [vmem:[#allocation2 + $0x128] ss:$16 sps:$4 sm:$0xff]   ;;  %v5246_v40 = vld [vmem:[#allocation2 + $0x144] ss:$16 sps:$4 sm:$0xff]  }
  0x58   :  { %1320 = vmatpush1.bf16.msra.mxu0 %v5208_v14  ;;  %1484 = vmatpush1.bf16.msra.mxu1 %v5209_v15  ;;  %v5248_v41 = vld [vmem:[#allocation2 + $0x14c] ss:$16 sps:$4 sm:$0xff]   ;;  %v5250_v42 = vld [vmem:[#allocation2 + $0x140] ss:$16 sps:$4 sm:$0xff]   ;;  %v5251_v43 = vld [vmem:[#allocation2 + $0x148] ss:$16 sps:$4 sm:$0xff]  }
  0x59   :  { %1321 = vmatprep.subr.bf16.mxu0 %v5210_v16  ;;  %1485 = vmatprep.subr.bf16.mxu1 %v5212_v17  ;;  %v5252_v44 = vld [vmem:[#allocation2 + $0x164] ss:$16 sps:$4 sm:$0xff]   ;;  %v5254_v45 = vld [vmem:[#allocation2 + $0x16c] ss:$16 sps:$4 sm:$0xff]   ;;  %v5256_v47 = vld [vmem:[#allocation2 + $0x160] ss:$16 sps:$4 sm:$0xff]  }
  0x5a   :  { %v98_v46 = vld [vmem:[%s6396_s0 + $0x8] sm:$0xff]  ;;  %v5258_v50 = vld [vmem:[#allocation2 + $0x184] ss:$16 sps:$4 sm:$0xff]   ;;  %v5262_v52 = vld [vmem:[#allocation2 + $0x180] ss:$16 sps:$4 sm:$0xff]   ;;  %vm1309_vm0 = vcmask 130048  }
  0x5b   :  { %v105_v48 = vpack.c.bf16 %v98_v46, %v98_v46  ;;  %v5257_v49 = vld [vmem:[#allocation2 + $0x168] ss:$16 sps:$4 sm:$0xff]   ;;  %v5260_v51 = vld [vmem:[#allocation2 + $0x18c] ss:$16 sps:$4 sm:$0xff]   ;;  %v5264_v54 = vld [vmem:[#allocation2 + $0x1a4] ss:$16 sps:$4 sm:$0xff]  }
  0x5c   :  { %1322 = vmatpush1.bf16.msra.mxu0 %v5214_v18  ;;  %1486 = vmatpush1.bf16.msra.mxu1 %v5215_v19  ;;  %v5263_v53 = vld [vmem:[#allocation2 + $0x188] ss:$16 sps:$4 sm:$0xff]   ;;  %v5266_v55 = vld [vmem:[#allocation2 + $0x1ac] ss:$16 sps:$4 sm:$0xff]   ;;  %v5268_v56 = vld [vmem:[#allocation2 + $0x1a0] ss:$16 sps:$4 sm:$0xff]  }
  0x5d   :  { %1323 = vmatprep.subr.bf16.mxu0 %v5216_v20  ;;  %1487 = vmatprep.subr.bf16.mxu1 %v5218_v21  ;;  %v5269_v57 = vld [vmem:[#allocation2 + $0x1a8] ss:$16 sps:$4 sm:$0xff]   ;;  %v5270_v58 = vld [vmem:[#allocation2 + $0x1c4] ss:$16 sps:$4 sm:$0xff]   ;;  %v5272_v59 = vld [vmem:[#allocation2 + $0x1cc] ss:$16 sps:$4 sm:$0xff]  }
  0x5e   :  { %1345 = vmatprep.mubr.bf16.mxu0 %v105_v48  ;;  %1509 = vmatprep.mubr.bf16.mxu1 %v105_v48  ;;  %v5274_v60 = vld [vmem:[#allocation2 + $0x1c0] ss:$16 sps:$4 sm:$0xff]   ;;  %v5275_v61 = vld [vmem:[#allocation2 + $0x1c8] ss:$16 sps:$4 sm:$0xff]   ;;  %v5276_v62 = vld [vmem:[#allocation2 + $0x1e4] ss:$16 sps:$4 sm:$0xff]  }
  0x5f   :  { %v5278_v63 = vld [vmem:[#allocation2 + $0x1ec] ss:$16 sps:$4 sm:$0xff]   ;;  %v5280_v0 = vld [vmem:[#allocation2 + $0x1e0] ss:$16 sps:$4 sm:$0xff]   ;;  %v5281_v1 = vld [vmem:[#allocation2 + $0x1e8] ss:$16 sps:$4 sm:$0xff]  }
  0x60   :  { %1324 = vmatpush1.bf16.msra.mxu0 %v5220_v22  ;;  %1488 = vmatpush1.bf16.msra.mxu1 %v5221_v23  ;;  %v97_v2 = vld [vmem:[%s6396_s0] sm:$0xff]  ;;  %v5287_v4 = vld [vmem:[#allocation2 + $0x20c] ss:$16 sps:$4 sm:$0xff]   ;;  %v5285_v7 = vld [vmem:[#allocation2 + $0x208] ss:$16 sps:$4 sm:$0xff]  }
  0x61   :  { %1325 = vmatprep.subr.bf16.mxu0 %v5222_v24  ;;  %1489 = vmatprep.subr.bf16.mxu1 %v5224_v25  ;;  %v5284_v3 = vld [vmem:[#allocation2 + $0x204] ss:$16 sps:$4 sm:$0xff]   ;;  %v104_v5 = vpack.c.bf16 %v97_v2, %v97_v2  ;;  %v5282_v6 = vld [vmem:[#allocation2 + $0x200] ss:$16 sps:$4 sm:$0xff]   ;;  %v5293_v9 = vld [vmem:[#allocation2 + $0x22c] ss:$16 sps:$4 sm:$0xff]  }
  0x62   :  { %v5290_v8 = vld [vmem:[#allocation2 + $0x224] ss:$16 sps:$4 sm:$0xff]   ;;  %v5288_v10 = vld [vmem:[#allocation2 + $0x220] ss:$16 sps:$4 sm:$0xff]   ;;  %v5291_v11 = vld [vmem:[#allocation2 + $0x228] ss:$16 sps:$4 sm:$0xff]  }
  0x63   :  { %v5296_v12 = vld [vmem:[#allocation2 + $0x244] ss:$16 sps:$4 sm:$0xff]   ;;  %v5299_v13 = vld [vmem:[#allocation2 + $0x24c] ss:$16 sps:$4 sm:$0xff]   ;;  %v5294_v14 = vld [vmem:[#allocation2 + $0x240] ss:$16 sps:$4 sm:$0xff]  }
  0x64   :  { %1326 = vmatpush1.bf16.msra.mxu0 %v5226_v26  ;;  %1490 = vmatpush1.bf16.msra.mxu1 %v5227_v27  ;;  %v5297_v15 = vld [vmem:[#allocation2 + $0x248] ss:$16 sps:$4 sm:$0xff]   ;;  %v5302_v16 = vld [vmem:[#allocation2 + $0x264] ss:$16 sps:$4 sm:$0xff]   ;;  %v5305_v17 = vld [vmem:[#allocation2 + $0x26c] ss:$16 sps:$4 sm:$0xff]  }
  0x65   :  { %1327 = vmatprep.subr.bf16.mxu0 %v5228_v28  ;;  %1491 = vmatprep.subr.bf16.mxu1 %v5230_v29  ;;  %v5300_v18 = vld [vmem:[#allocation2 + $0x260] ss:$16 sps:$4 sm:$0xff]   ;;  %v5303_v19 = vld [vmem:[#allocation2 + $0x268] ss:$16 sps:$4 sm:$0xff]   ;;  %v5308_v20 = vld [vmem:[#allocation2 + $0x284] ss:$16 sps:$4 sm:$0xff]  }
  0x66   :  { %v5311_v21 = vld [vmem:[#allocation2 + $0x28c] ss:$16 sps:$4 sm:$0xff]   ;;  %v5306_v22 = vld [vmem:[#allocation2 + $0x280] ss:$16 sps:$4 sm:$0xff]   ;;  %v5309_v23 = vld [vmem:[#allocation2 + $0x288] ss:$16 sps:$4 sm:$0xff]  }
  0x67   :  { %v5314_v24 = vld [vmem:[#allocation2 + $0x2a4] ss:$16 sps:$4 sm:$0xff]   ;;  %v5317_v25 = vld [vmem:[#allocation2 + $0x2ac] ss:$16 sps:$4 sm:$0xff]   ;;  %v5312_v26 = vld [vmem:[#allocation2 + $0x2a0] ss:$16 sps:$4 sm:$0xff]  }
  0x68   :  { %1328 = vmatpush1.bf16.msra.mxu0 %v5232_v30  ;;  %1492 = vmatpush1.bf16.msra.mxu1 %v5233_v31  ;;  %v5315_v27 = vld [vmem:[#allocation2 + $0x2a8] ss:$16 sps:$4 sm:$0xff]   ;;  %v5320_v28 = vld [vmem:[#allocation2 + $0x2c4] ss:$16 sps:$4 sm:$0xff]   ;;  %v5323_v29 = vld [vmem:[#allocation2 + $0x2cc] ss:$16 sps:$4 sm:$0xff]  }
  0x69   :  { %1329 = vmatprep.subr.bf16.mxu0 %v5234_v32  ;;  %1493 = vmatprep.subr.bf16.mxu1 %v5236_v33  ;;  %v100_v30 = vld [vmem:[%s6396_s0 + $0x18] sm:$0xff]  ;;  %v5318_v31 = vld [vmem:[#allocation2 + $0x2c0] ss:$16 sps:$4 sm:$0xff]   ;;  %v5344_v46 = vld [vmem:[#allocation2 + $0x344] ss:$16 sps:$4 sm:$0xff]  }
  0x6a   :  { %v107_v32 = vpack.c.bf16 %v100_v30, %v100_v30  ;;  %v5321_v33 = vld [vmem:[#allocation2 + $0x2c8] ss:$16 sps:$4 sm:$0xff]   ;;  %v5342_v48 = vld [vmem:[#allocation2 + $0x340] ss:$16 sps:$4 sm:$0xff]   ;;  %v5374_v2 = vld [vmem:[#allocation2 + $0x3e4] ss:$16 sps:$4 sm:$0xff]  }
  0x6b   :  { %v5410_v30 = vld [vmem:[#allocation2 + $0x4a4] ss:$16 sps:$4 sm:$0xff]  }
  0x6c   :  { %1330 = vmatpush1.bf16.msra.mxu0 %v5238_v34  ;;  %1494 = vmatpush1.bf16.msra.mxu1 %v5239_v35  ;;  %v5326_v34 = vld [vmem:[#allocation2 + $0x2e4] ss:$16 sps:$4 sm:$0xff]   ;;  %v5329_v35 = vld [vmem:[#allocation2 + $0x2ec] ss:$16 sps:$4 sm:$0xff]  }
  0x6d   :  { %1331 = vmatprep.subr.bf16.mxu0 %v5240_v36  ;;  %1495 = vmatprep.subr.bf16.mxu1 %v5242_v37  ;;  %v5324_v36 = vld [vmem:[#allocation2 + $0x2e0] ss:$16 sps:$4 sm:$0xff]   ;;  %v5327_v37 = vld [vmem:[#allocation2 + $0x2e8] ss:$16 sps:$4 sm:$0xff]  }
  0x70   :  { %1332 = vmatpush1.bf16.msra.mxu0 %v5244_v38  ;;  %1496 = vmatpush1.bf16.msra.mxu1 %v5245_v39  ;;  %v5332_v38 = vld [vmem:[#allocation2 + $0x304] ss:$16 sps:$4 sm:$0xff]   ;;  %v5335_v39 = vld [vmem:[#allocation2 + $0x30c] ss:$16 sps:$4 sm:$0xff]  }
  0x71   :  { %1333 = vmatprep.subr.bf16.mxu0 %v5246_v40  ;;  %1497 = vmatprep.subr.bf16.mxu1 %v5248_v41  ;;  %v5330_v40 = vld [vmem:[#allocation2 + $0x300] ss:$16 sps:$4 sm:$0xff]   ;;  %v5333_v41 = vld [vmem:[#allocation2 + $0x308] ss:$16 sps:$4 sm:$0xff]  }
  0x74   :  { %1334 = vmatpush1.bf16.msra.mxu0 %v5250_v42  ;;  %1498 = vmatpush1.bf16.msra.mxu1 %v5251_v43  ;;  %v5338_v42 = vld [vmem:[#allocation2 + $0x324] ss:$16 sps:$4 sm:$0xff]   ;;  %v5341_v43 = vld [vmem:[#allocation2 + $0x32c] ss:$16 sps:$4 sm:$0xff]  }
  0x75   :  { %1335 = vmatprep.subr.bf16.mxu0 %v5252_v44  ;;  %1499 = vmatprep.subr.bf16.mxu1 %v5254_v45  ;;  %v5336_v44 = vld [vmem:[#allocation2 + $0x320] ss:$16 sps:$4 sm:$0xff]   ;;  %v5339_v45 = vld [vmem:[#allocation2 + $0x328] ss:$16 sps:$4 sm:$0xff]  }
  0x78   :  { %1336 = vmatpush1.bf16.msra.mxu0 %v5256_v47  ;;  %1500 = vmatpush1.bf16.msra.mxu1 %v5257_v49  ;;  %v5347_v47 = vld [vmem:[#allocation2 + $0x34c] ss:$16 sps:$4 sm:$0xff]   ;;  %v5345_v49 = vld [vmem:[#allocation2 + $0x348] ss:$16 sps:$4 sm:$0xff]  }
  0x79   :  { %1337 = vmatprep.subr.bf16.mxu0 %v5258_v50  ;;  %1501 = vmatprep.subr.bf16.mxu1 %v5260_v51  ;;  %v5350_v50 = vld [vmem:[#allocation2 + $0x364] ss:$16 sps:$4 sm:$0xff]   ;;  %v5353_v51 = vld [vmem:[#allocation2 + $0x36c] ss:$16 sps:$4 sm:$0xff]  }
  0x7c   :  { %1338 = vmatpush1.bf16.msra.mxu0 %v5262_v52  ;;  %1502 = vmatpush1.bf16.msra.mxu1 %v5263_v53  ;;  %v5348_v52 = vld [vmem:[#allocation2 + $0x360] ss:$16 sps:$4 sm:$0xff]   ;;  %v5351_v53 = vld [vmem:[#allocation2 + $0x368] ss:$16 sps:$4 sm:$0xff]  }
  0x7d   :  { %1339 = vmatprep.subr.bf16.mxu0 %v5264_v54  ;;  %1503 = vmatprep.subr.bf16.mxu1 %v5266_v55  ;;  %v5356_v54 = vld [vmem:[#allocation2 + $0x384] ss:$16 sps:$4 sm:$0xff]   ;;  %v5359_v55 = vld [vmem:[#allocation2 + $0x38c] ss:$16 sps:$4 sm:$0xff]  }
  0x80   :  { %1340 = vmatpush1.bf16.msra.mxu0 %v5268_v56  ;;  %1504 = vmatpush1.bf16.msra.mxu1 %v5269_v57  ;;  %v5354_v56 = vld [vmem:[#allocation2 + $0x380] ss:$16 sps:$4 sm:$0xff]   ;;  %v5357_v57 = vld [vmem:[#allocation2 + $0x388] ss:$16 sps:$4 sm:$0xff]  }
  0x81   :  { %1341 = vmatprep.subr.bf16.mxu0 %v5270_v58  ;;  %1505 = vmatprep.subr.bf16.mxu1 %v5272_v59  ;;  %v5362_v58 = vld [vmem:[#allocation2 + $0x3a4] ss:$16 sps:$4 sm:$0xff]   ;;  %v5365_v59 = vld [vmem:[#allocation2 + $0x3ac] ss:$16 sps:$4 sm:$0xff]  }
  0x84   :  { %1342 = vmatpush1.bf16.msra.mxu0 %v5274_v60  ;;  %1506 = vmatpush1.bf16.msra.mxu1 %v5275_v61  ;;  %v5360_v60 = vld [vmem:[#allocation2 + $0x3a0] ss:$16 sps:$4 sm:$0xff]   ;;  %v5363_v61 = vld [vmem:[#allocation2 + $0x3a8] ss:$16 sps:$4 sm:$0xff]  }
  0x85   :  { %1343 = vmatprep.subr.bf16.mxu0 %v5276_v62  ;;  %1507 = vmatprep.subr.bf16.mxu1 %v5278_v63  ;;  %v5368_v62 = vld [vmem:[#allocation2 + $0x3c4] ss:$16 sps:$4 sm:$0xff]   ;;  %v5371_v63 = vld [vmem:[#allocation2 + $0x3cc] ss:$16 sps:$4 sm:$0xff]  }
  0x88   :  { %1344 = vmatpush1.bf16.msra.mxu0 %v5280_v0  ;;  %1508 = vmatpush1.bf16.msra.mxu1 %v5281_v1  ;;  %v5366_v0 = vld [vmem:[#allocation2 + $0x3c0] ss:$16 sps:$4 sm:$0xff]   ;;  %v5369_v1 = vld [vmem:[#allocation2 + $0x3c8] ss:$16 sps:$4 sm:$0xff]  }
  0x89   :  { %1354 = vmatprep.subr.bf16.mxu0 %v5284_v3  ;;  %1518 = vmatprep.subr.bf16.mxu1 %v5287_v4  ;;  %v5377_v3 = vld [vmem:[#allocation2 + $0x3ec] ss:$16 sps:$4 sm:$0xff]   ;;  %v5372_v4 = vld [vmem:[#allocation2 + $0x3e0] ss:$16 sps:$4 sm:$0xff]  }
  0x8b   :  { %1346 = vmatmul.mubr.bf16.vlgmr.msra.gmra.mrb[0].mxu0 %v104_v5  ;;  %1510 = vmatmul.mubr.bf16.vlgmr.msra.gmra.mrb[0].mxu1 %v104_v5  ;;  %v5375_v5 = vld [vmem:[#allocation2 + $0x3e8] ss:$16 sps:$4 sm:$0xff]  }
  0x8c   :  { %1355 = vmatpush1.bf16.msra.mxu0 %v5282_v6  ;;  %1519 = vmatpush1.bf16.msra.mxu1 %v5285_v7  ;;  %v5380_v6 = vld [vmem:[#allocation2 + $0x404] ss:$16 sps:$4 sm:$0xff]  }
  0x8d   :  { %1356 = vmatprep.subr.bf16.mxu0 %v5290_v8  ;;  %1520 = vmatprep.subr.bf16.mxu1 %v5293_v9  ;;  %v99_v7 = vld [vmem:[%s6396_s0 + $0x10] sm:$0xff]  ;;  %v5383_v8 = vld [vmem:[#allocation2 + $0x40c] ss:$16 sps:$4 sm:$0xff]  }
  0x8e   :  { %1386 = vmatprep.mubr.bf16.mxu0 %v107_v32  ;;  %1550 = vmatprep.mubr.bf16.mxu1 %v107_v32  ;;  %v5378_v9 = vld [vmem:[#allocation2 + $0x400] ss:$16 sps:$4 sm:$0xff]  }
  0x8f   :  { %v5408_v32 = vld [vmem:[#allocation2 + $0x4a0] ss:$16 sps:$4 sm:$0xff]  }
  0x90   :  { %1357 = vmatpush1.bf16.msra.mxu0 %v5288_v10  ;;  %1521 = vmatpush1.bf16.msra.mxu1 %v5291_v11  ;;  %v106_v10 = vpack.c.bf16 %v99_v7, %v99_v7  ;;  %v5381_v11 = vld [vmem:[#allocation2 + $0x408] ss:$16 sps:$4 sm:$0xff]   ;;  %v5473_v7 = vld [vmem:[#allocation2 + $0x5ec] ss:$16 sps:$4 sm:$0xff]  }
  0x91   :  { %1358 = vmatprep.subr.bf16.mxu0 %v5296_v12  ;;  %1522 = vmatprep.subr.bf16.mxu1 %v5299_v13  ;;  %v5386_v12 = vld [vmem:[#allocation2 + $0x424] ss:$16 sps:$4 sm:$0xff]   ;;  %v5389_v13 = vld [vmem:[#allocation2 + $0x42c] ss:$16 sps:$4 sm:$0xff]  }
  0x94   :  { %1359 = vmatpush1.bf16.msra.mxu0 %v5294_v14  ;;  %1523 = vmatpush1.bf16.msra.mxu1 %v5297_v15  ;;  %v102_v14 = vld [vmem:[%s6396_s0 + $0x28] sm:$0xff] }
  0x95   :  { %1360 = vmatprep.subr.bf16.mxu0 %v5302_v16  ;;  %1524 = vmatprep.subr.bf16.mxu1 %v5305_v17  ;;  %v109_v15 = vpack.c.bf16 %v102_v14, %v102_v14  ;;  %v5384_v16 = vld [vmem:[#allocation2 + $0x420] ss:$16 sps:$4 sm:$0xff]   ;;  %v5387_v17 = vld [vmem:[#allocation2 + $0x428] ss:$16 sps:$4 sm:$0xff]  }
  0x96   :  { %v5477_v14 = vld [vmem:[#allocation2 + $0x608] ss:$16 sps:$4 sm:$0xff]  }
  0x98   :  { %1361 = vmatpush1.bf16.msra.mxu0 %v5300_v18  ;;  %1525 = vmatpush1.bf16.msra.mxu1 %v5303_v19  ;;  %v5392_v18 = vld [vmem:[#allocation2 + $0x444] ss:$16 sps:$4 sm:$0xff]   ;;  %v5395_v19 = vld [vmem:[#allocation2 + $0x44c] ss:$16 sps:$4 sm:$0xff]  }
  0x99   :  { %1362 = vmatprep.subr.bf16.mxu0 %v5308_v20  ;;  %1526 = vmatprep.subr.bf16.mxu1 %v5311_v21  ;;  %v5390_v20 = vld [vmem:[#allocation2 + $0x440] ss:$16 sps:$4 sm:$0xff]   ;;  %v5393_v21 = vld [vmem:[#allocation2 + $0x448] ss:$16 sps:$4 sm:$0xff]  }
  0x9c   :  { %1363 = vmatpush1.bf16.msra.mxu0 %v5306_v22  ;;  %1527 = vmatpush1.bf16.msra.mxu1 %v5309_v23  ;;  %v5398_v22 = vld [vmem:[#allocation2 + $0x464] ss:$16 sps:$4 sm:$0xff]   ;;  %v5401_v23 = vld [vmem:[#allocation2 + $0x46c] ss:$16 sps:$4 sm:$0xff]  }
  0x9d   :  { %1364 = vmatprep.subr.bf16.mxu0 %v5314_v24  ;;  %1528 = vmatprep.subr.bf16.mxu1 %v5317_v25  ;;  %v5396_v24 = vld [vmem:[#allocation2 + $0x460] ss:$16 sps:$4 sm:$0xff]   ;;  %v5399_v25 = vld [vmem:[#allocation2 + $0x468] ss:$16 sps:$4 sm:$0xff]  }
  0xa0   :  { %1365 = vmatpush1.bf16.msra.mxu0 %v5312_v26  ;;  %1529 = vmatpush1.bf16.msra.mxu1 %v5315_v27  ;;  %v5404_v26 = vld [vmem:[#allocation2 + $0x484] ss:$16 sps:$4 sm:$0xff]   ;;  %v5407_v27 = vld [vmem:[#allocation2 + $0x48c] ss:$16 sps:$4 sm:$0xff]  }
  0xa1   :  { %1366 = vmatprep.subr.bf16.mxu0 %v5320_v28  ;;  %1530 = vmatprep.subr.bf16.mxu1 %v5323_v29  ;;  %v5402_v28 = vld [vmem:[#allocation2 + $0x480] ss:$16 sps:$4 sm:$0xff]   ;;  %v5405_v29 = vld [vmem:[#allocation2 + $0x488] ss:$16 sps:$4 sm:$0xff]  }
  0xa4   :  { %1367 = vmatpush1.bf16.msra.mxu0 %v5318_v31  ;;  %1531 = vmatpush1.bf16.msra.mxu1 %v5321_v33  ;;  %v5413_v31 = vld [vmem:[#allocation2 + $0x4ac] ss:$16 sps:$4 sm:$0xff]   ;;  %v5411_v33 = vld [vmem:[#allocation2 + $0x4a8] ss:$16 sps:$4 sm:$0xff]  }
  0xa5   :  { %1368 = vmatprep.subr.bf16.mxu0 %v5326_v34  ;;  %1532 = vmatprep.subr.bf16.mxu1 %v5329_v35  ;;  %v5416_v34 = vld [vmem:[#allocation2 + $0x4c4] ss:$16 sps:$4 sm:$0xff]   ;;  %v5419_v35 = vld [vmem:[#allocation2 + $0x4cc] ss:$16 sps:$4 sm:$0xff]  }
  0xa8   :  { %1369 = vmatpush1.bf16.msra.mxu0 %v5324_v36  ;;  %1533 = vmatpush1.bf16.msra.mxu1 %v5327_v37  ;;  %v5414_v36 = vld [vmem:[#allocation2 + $0x4c0] ss:$16 sps:$4 sm:$0xff]   ;;  %v5417_v37 = vld [vmem:[#allocation2 + $0x4c8] ss:$16 sps:$4 sm:$0xff]  }
  0xa9   :  { %1370 = vmatprep.subr.bf16.mxu0 %v5332_v38  ;;  %1534 = vmatprep.subr.bf16.mxu1 %v5335_v39  ;;  %v5422_v38 = vld [vmem:[#allocation2 + $0x4e4] ss:$16 sps:$4 sm:$0xff]   ;;  %v5425_v39 = vld [vmem:[#allocation2 + $0x4ec] ss:$16 sps:$4 sm:$0xff]  }
  0xac   :  { %1371 = vmatpush1.bf16.msra.mxu0 %v5330_v40  ;;  %1535 = vmatpush1.bf16.msra.mxu1 %v5333_v41  ;;  %v5420_v40 = vld [vmem:[#allocation2 + $0x4e0] ss:$16 sps:$4 sm:$0xff]   ;;  %v5423_v41 = vld [vmem:[#allocation2 + $0x4e8] ss:$16 sps:$4 sm:$0xff]  }
  0xad   :  { %1372 = vmatprep.subr.bf16.mxu0 %v5338_v42  ;;  %1536 = vmatprep.subr.bf16.mxu1 %v5341_v43  ;;  %v5428_v42 = vld [vmem:[#allocation2 + $0x504] ss:$16 sps:$4 sm:$0xff]   ;;  %v5431_v43 = vld [vmem:[#allocation2 + $0x50c] ss:$16 sps:$4 sm:$0xff]  }
  0xb0   :  { %1373 = vmatpush1.bf16.msra.mxu0 %v5336_v44  ;;  %1537 = vmatpush1.bf16.msra.mxu1 %v5339_v45  ;;  %v5426_v44 = vld [vmem:[#allocation2 + $0x500] ss:$16 sps:$4 sm:$0xff]   ;;  %v5429_v45 = vld [vmem:[#allocation2 + $0x508] ss:$16 sps:$4 sm:$0xff]  }
  0xb1   :  { %1374 = vmatprep.subr.bf16.mxu0 %v5344_v46  ;;  %1538 = vmatprep.subr.bf16.mxu1 %v5347_v47  ;;  %v5434_v46 = vld [vmem:[#allocation2 + $0x524] ss:$16 sps:$4 sm:$0xff]   ;;  %v5437_v47 = vld [vmem:[#allocation2 + $0x52c] ss:$16 sps:$4 sm:$0xff]  }
  0xb4   :  { %1375 = vmatpush1.bf16.msra.mxu0 %v5342_v48  ;;  %1539 = vmatpush1.bf16.msra.mxu1 %v5345_v49  ;;  %v5432_v48 = vld [vmem:[#allocation2 + $0x520] ss:$16 sps:$4 sm:$0xff]   ;;  %v5435_v49 = vld [vmem:[#allocation2 + $0x528] ss:$16 sps:$4 sm:$0xff]  }
  0xb5   :  { %1376 = vmatprep.subr.bf16.mxu0 %v5350_v50  ;;  %1540 = vmatprep.subr.bf16.mxu1 %v5353_v51  ;;  %v5440_v50 = vld [vmem:[#allocation2 + $0x544] ss:$16 sps:$4 sm:$0xff]   ;;  %v5443_v51 = vld [vmem:[#allocation2 + $0x54c] ss:$16 sps:$4 sm:$0xff]  }
  0xb8   :  { %1377 = vmatpush1.bf16.msra.mxu0 %v5348_v52  ;;  %1541 = vmatpush1.bf16.msra.mxu1 %v5351_v53  ;;  %v5438_v52 = vld [vmem:[#allocation2 + $0x540] ss:$16 sps:$4 sm:$0xff]   ;;  %v5441_v53 = vld [vmem:[#allocation2 + $0x548] ss:$16 sps:$4 sm:$0xff]  }
  0xb9   :  { %1378 = vmatprep.subr.bf16.mxu0 %v5356_v54  ;;  %1542 = vmatprep.subr.bf16.mxu1 %v5359_v55  ;;  %v5446_v54 = vld [vmem:[#allocation2 + $0x564] ss:$16 sps:$4 sm:$0xff]   ;;  %v5449_v55 = vld [vmem:[#allocation2 + $0x56c] ss:$16 sps:$4 sm:$0xff]  }
  0xbc   :  { %1379 = vmatpush1.bf16.msra.mxu0 %v5354_v56  ;;  %1543 = vmatpush1.bf16.msra.mxu1 %v5357_v57  ;;  %v5444_v56 = vld [vmem:[#allocation2 + $0x560] ss:$16 sps:$4 sm:$0xff]   ;;  %v5447_v57 = vld [vmem:[#allocation2 + $0x568] ss:$16 sps:$4 sm:$0xff]  }
  0xbd   :  { %1380 = vmatprep.subr.bf16.mxu0 %v5362_v58  ;;  %1544 = vmatprep.subr.bf16.mxu1 %v5365_v59  ;;  %v5452_v58 = vld [vmem:[#allocation2 + $0x584] ss:$16 sps:$4 sm:$0xff]   ;;  %v5455_v59 = vld [vmem:[#allocation2 + $0x58c] ss:$16 sps:$4 sm:$0xff]  }
  0xc0   :  { %1381 = vmatpush1.bf16.msra.mxu0 %v5360_v60  ;;  %1545 = vmatpush1.bf16.msra.mxu1 %v5363_v61  ;;  %v5450_v60 = vld [vmem:[#allocation2 + $0x580] ss:$16 sps:$4 sm:$0xff]   ;;  %v5453_v61 = vld [vmem:[#allocation2 + $0x588] ss:$16 sps:$4 sm:$0xff]  }
  0xc1   :  { %1382 = vmatprep.subr.bf16.mxu0 %v5368_v62  ;;  %1546 = vmatprep.subr.bf16.mxu1 %v5371_v63  ;;  %v5458_v62 = vld [vmem:[#allocation2 + $0x5a4] ss:$16 sps:$4 sm:$0xff]   ;;  %v5461_v63 = vld [vmem:[#allocation2 + $0x5ac] ss:$16 sps:$4 sm:$0xff]  }
  0xc4   :  { %1383 = vmatpush1.bf16.msra.mxu0 %v5366_v0  ;;  %1547 = vmatpush1.bf16.msra.mxu1 %v5369_v1  ;;  %v5456_v0 = vld [vmem:[#allocation2 + $0x5a0] ss:$16 sps:$4 sm:$0xff]   ;;  %v5459_v1 = vld [vmem:[#allocation2 + $0x5a8] ss:$16 sps:$4 sm:$0xff]  }
  0xc5   :  { %1384 = vmatprep.subr.bf16.mxu0 %v5374_v2  ;;  %1548 = vmatprep.subr.bf16.mxu1 %v5377_v3  ;;  %v5464_v2 = vld [vmem:[#allocation2 + $0x5c4] ss:$16 sps:$4 sm:$0xff]   ;;  %v5467_v3 = vld [vmem:[#allocation2 + $0x5cc] ss:$16 sps:$4 sm:$0xff]  }
  0xc8   :  { %1385 = vmatpush1.bf16.msra.mxu0 %v5372_v4  ;;  %1549 = vmatpush1.bf16.msra.mxu1 %v5375_v5  ;;  %v5462_v4 = vld [vmem:[#allocation2 + $0x5c0] ss:$16 sps:$4 sm:$0xff]   ;;  %v5465_v5 = vld [vmem:[#allocation2 + $0x5c8] ss:$16 sps:$4 sm:$0xff]  }
  0xc9   :  { %1395 = vmatprep.subr.bf16.mxu0 %v5380_v6  ;;  %1559 = vmatprep.subr.bf16.mxu1 %v5383_v8  ;;  %v5470_v6 = vld [vmem:[#allocation2 + $0x5e4] ss:$16 sps:$4 sm:$0xff]   ;;  %v5468_v8 = vld [vmem:[#allocation2 + $0x5e0] ss:$16 sps:$4 sm:$0xff]  }
  0xcb   :  { %1387 = vmatmul.mubr.bf16.vlgmr.msra.gmra.mrb[0].mxu0 %v106_v10  ;;  %1551 = vmatmul.mubr.bf16.vlgmr.msra.gmra.mrb[0].mxu1 %v106_v10  ;;  %v101_v10 = vld [vmem:[%s6396_s0 + $0x20] sm:$0xff] }
  0xcc   :  { %1396 = vmatpush1.bf16.msra.mxu0 %v5378_v9  ;;  %1560 = vmatpush1.bf16.msra.mxu1 %v5381_v11  ;;  %v5471_v9 = vld [vmem:[#allocation2 + $0x5e8] ss:$16 sps:$4 sm:$0xff]   ;;  %v5476_v11 = vld [vmem:[#allocation2 + $0x604] ss:$16 sps:$4 sm:$0xff]  }
  0xcd   :  { %1397 = vmatprep.subr.bf16.mxu0 %v5386_v12  ;;  %1561 = vmatprep.subr.bf16.mxu1 %v5389_v13  ;;  %v5479_v12 = vld [vmem:[#allocation2 + $0x60c] ss:$16 sps:$4 sm:$0xff]   ;;  %v5474_v13 = vld [vmem:[#allocation2 + $0x600] ss:$16 sps:$4 sm:$0xff]  }
  0xce   :  { %1427 = vmatprep.mubr.bf16.mxu0 %v109_v15  ;;  %1591 = vmatprep.mubr.bf16.mxu1 %v109_v15  ;;  %v108_v15 = vpack.c.bf16 %v101_v10, %v101_v10 }
  0xd0   :  { %1398 = vmatpush1.bf16.msra.mxu0 %v5384_v16  ;;  %1562 = vmatpush1.bf16.msra.mxu1 %v5387_v17  ;;  %v5480_v16 = vld [vmem:[%s6400_s4 + $0x40] sm:$0xff]  }
  0xd1   :  { %1399 = vmatprep.subr.bf16.mxu0 %v5392_v18  ;;  %1563 = vmatprep.subr.bf16.mxu1 %v5395_v19  ;;  %v5482_v17 = vld [vmem:[#allocation4 + $0x40] sm:$0xff]   ;;  %v6044_v18 = vmov 0   ;;  %v103_v19 = vld [vmem:[%s6396_s0 + $0x30] sm:$0xff] }
  0xd4   :  { %1400 = vmatpush1.bf16.msra.mxu0 %v5390_v20  ;;  %1564 = vmatpush1.bf16.msra.mxu1 %v5393_v21  ;;  %v5481_v20 = vld [vmem:[%s6400_s4] sm:$0xff]  }
  0xd5   :  { %1401 = vmatprep.subr.bf16.mxu0 %v5398_v22  ;;  %1565 = vmatprep.subr.bf16.mxu1 %v5401_v23  ;;  %v5483_v21 = vld [vmem:[#allocation4] sm:$0xff]   ;;  %v110_v22 = vpack.c.bf16 %v103_v19, %v103_v19  ;;  %v5484_v23 = vld [vmem:[%s6400_s4 + $0x48] sm:$0xff]   ;;  %v5517_v19 = vld [vmem:[%s6400_s4 + $0x90] sm:$0xff]  }
  0xd8   :  { %1402 = vmatpush1.bf16.msra.mxu0 %v5396_v24  ;;  %1566 = vmatpush1.bf16.msra.mxu1 %v5399_v25  ;;  %v5486_v24 = vld [vmem:[#allocation4 + $0x48] sm:$0xff]  }
  0xd9   :  { %1403 = vmatprep.subr.bf16.mxu0 %v5404_v26  ;;  %1567 = vmatprep.subr.bf16.mxu1 %v5407_v27  ;;  %v5485_v25 = vld [vmem:[%s6400_s4 + $0x8] sm:$0xff]   ;;  %v5488_v27 = vld [vmem:[%s6400_s4 + $0x50] sm:$0xff]  }
  0xda   :  { %v5487_v26 = vld [vmem:[#allocation4 + $0x8] sm:$0xff]  }
  0xdc   :  { %1404 = vmatpush1.bf16.msra.mxu0 %v5402_v28  ;;  %1568 = vmatpush1.bf16.msra.mxu1 %v5405_v29  ;;  %v5490_v28 = vld [vmem:[#allocation4 + $0x50] sm:$0xff]  }
  0xdd   :  { %1405 = vmatprep.subr.bf16.mxu0 %v5410_v30  ;;  %1569 = vmatprep.subr.bf16.mxu1 %v5413_v31  ;;  %v5489_v29 = vld [vmem:[%s6400_s4 + $0x10] sm:$0xff]   ;;  %v5492_v31 = vld [vmem:[%s6400_s4 + $0x58] sm:$0xff]  }
  0xde   :  { %v5491_v30 = vld [vmem:[#allocation4 + $0x10] sm:$0xff]  }
  0xe0   :  { %1406 = vmatpush1.bf16.msra.mxu0 %v5408_v32  ;;  %1570 = vmatpush1.bf16.msra.mxu1 %v5411_v33  ;;  %v5494_v32 = vld [vmem:[#allocation4 + $0x58] sm:$0xff]  }
  0xe1   :  { %1407 = vmatprep.subr.bf16.mxu0 %v5416_v34  ;;  %1571 = vmatprep.subr.bf16.mxu1 %v5419_v35  ;;  %v5493_v33 = vld [vmem:[%s6400_s4 + $0x18] sm:$0xff]   ;;  %v5496_v35 = vld [vmem:[%s6400_s4 + $0x60] sm:$0xff]  }
  0xe2   :  { %v5495_v34 = vld [vmem:[#allocation4 + $0x18] sm:$0xff]  }
  0xe4   :  { %1408 = vmatpush1.bf16.msra.mxu0 %v5414_v36  ;;  %1572 = vmatpush1.bf16.msra.mxu1 %v5417_v37  ;;  %v5498_v36 = vld [vmem:[#allocation4 + $0x60] sm:$0xff]  }
  0xe5   :  { %1409 = vmatprep.subr.bf16.mxu0 %v5422_v38  ;;  %1573 = vmatprep.subr.bf16.mxu1 %v5425_v39  ;;  %v5497_v37 = vld [vmem:[%s6400_s4 + $0x20] sm:$0xff]   ;;  %v5500_v39 = vld [vmem:[%s6400_s4 + $0x68] sm:$0xff]  }
  0xe6   :  { %v5499_v38 = vld [vmem:[#allocation4 + $0x20] sm:$0xff]  }
  0xe8   :  { %1410 = vmatpush1.bf16.msra.mxu0 %v5420_v40  ;;  %1574 = vmatpush1.bf16.msra.mxu1 %v5423_v41  ;;  %v5502_v40 = vld [vmem:[#allocation4 + $0x68] sm:$0xff]  }
  0xe9   :  { %1411 = vmatprep.subr.bf16.mxu0 %v5428_v42  ;;  %1575 = vmatprep.subr.bf16.mxu1 %v5431_v43  ;;  %v5501_v41 = vld [vmem:[%s6400_s4 + $0x28] sm:$0xff]   ;;  %v5504_v43 = vld [vmem:[%s6400_s4 + $0x70] sm:$0xff]  }
  0xea   :  { %v5503_v42 = vld [vmem:[#allocation4 + $0x28] sm:$0xff]  }
  0xec   :  { %1412 = vmatpush1.bf16.msra.mxu0 %v5426_v44  ;;  %1576 = vmatpush1.bf16.msra.mxu1 %v5429_v45  ;;  %v5505_v44 = vld [vmem:[%s6400_s4 + $0x30] sm:$0xff]  }
  0xed   :  { %1413 = vmatprep.subr.bf16.mxu0 %v5434_v46  ;;  %1577 = vmatprep.subr.bf16.mxu1 %v5437_v47  ;;  %v5506_v45 = vld [vmem:[#allocation4 + $0x70] sm:$0xff]   ;;  %v5508_v47 = vld [vmem:[%s6400_s4 + $0x78] sm:$0xff]  }
  0xee   :  { %v5507_v46 = vld [vmem:[#allocation4 + $0x30] sm:$0xff]  }
  0xf0   :  { %1414 = vmatpush1.bf16.msra.mxu0 %v5432_v48  ;;  %1578 = vmatpush1.bf16.msra.mxu1 %v5435_v49  ;;  %v5509_v48 = vld [vmem:[%s6400_s4 + $0x38] sm:$0xff]  }
  0xf1   :  { %1415 = vmatprep.subr.bf16.mxu0 %v5440_v50  ;;  %1579 = vmatprep.subr.bf16.mxu1 %v5443_v51  ;;  %v5510_v49 = vld [vmem:[#allocation4 + $0x78] sm:$0xff]   ;;  %v5512_v51 = vld [vmem:[%s6400_s4 + $0xc0] sm:$0xff]  }
  0xf2   :  { %v5511_v50 = vld [vmem:[#allocation4 + $0x38] sm:$0xff]  }
  0xf4   :  { %1416 = vmatpush1.bf16.msra.mxu0 %v5438_v52  ;;  %1580 = vmatpush1.bf16.msra.mxu1 %v5441_v53  ;;  %v309_v52 = vlaneseq }
  0xf5   :  { %1417 = vmatprep.subr.bf16.mxu0 %v5446_v54  ;;  %1581 = vmatprep.subr.bf16.mxu1 %v5449_v55  ;;  %v307_v55 = vld [vmem:[%s6399_s3] sm:$0xf] }
  0xf6   :  { %v6239_v53 = vshrl.u32 %v309_v52, 7  ;;  %v5546_v52 = vld [vmem:[#allocation6 + $0x4] ss:$16 sps:$4 sm:$0xff]  }
  0xf8   :  { %1418 = vmatpush1.bf16.msra.mxu0 %v5444_v56  ;;  %1582 = vmatpush1.bf16.msra.mxu1 %v5447_v57  ;;  %v6242_v54 = vsub.s32 0, %v6239_v53  ;;  %v6248_v56 = vsub.s32 1, %v6239_v53  ;;  %v6251_v57 = vsub.s32 3, %v6239_v53 }
  0xf9   :  { %1419 = vmatprep.subr.bf16.mxu0 %v5452_v58  ;;  %1583 = vmatprep.subr.bf16.mxu1 %v5455_v59 }
  0xfa   :  { %v312_v58 = vrot.slane %v307_v55, %v6242_v54  ;;  %v316_v59 = vrot.slane %v307_v55, %v6248_v56 }
  0xfc   :  { %1420 = vmatpush1.bf16.msra.mxu0 %v5450_v60  ;;  %1584 = vmatpush1.bf16.msra.mxu1 %v5453_v61  ;;  %v324_v60 = vrot.slane %v307_v55, %v6251_v57 }
  0xfd   :  { %1421 = vmatprep.subr.bf16.mxu0 %v5458_v62  ;;  %1585 = vmatprep.subr.bf16.mxu1 %v5461_v63 }
 0x100   :  { %1422 = vmatpush1.bf16.msra.mxu0 %v5456_v0  ;;  %1586 = vmatpush1.bf16.msra.mxu1 %v5459_v1 }
 0x101   :  { %1423 = vmatprep.subr.bf16.mxu0 %v5464_v2  ;;  %1587 = vmatprep.subr.bf16.mxu1 %v5467_v3 }
 0x104   :  { %1424 = vmatpush1.bf16.msra.mxu0 %v5462_v4  ;;  %1588 = vmatpush1.bf16.msra.mxu1 %v5465_v5 }
 0x105   :  { %1425 = vmatprep.subr.bf16.mxu0 %v5470_v6  ;;  %1589 = vmatprep.subr.bf16.mxu1 %v5473_v7 }
 0x108   :  { %1426 = vmatpush1.bf16.msra.mxu0 %v5468_v8  ;;  %1590 = vmatpush1.bf16.msra.mxu1 %v5471_v9 }
 0x109   :  { %1436 = vmatprep.subr.bf16.mxu0 %v5476_v11  ;;  %1600 = vmatprep.subr.bf16.mxu1 %v5479_v12  ;;  %v5513_v12 = vld [vmem:[%s6400_s4 + $0x80] sm:$0xff]  }
 0x10b   :  { %1428 = vmatmul.mubr.bf16.vlgmr.msra.gmra.mrb[0].mxu0 %v108_v15  ;;  %1592 = vmatmul.mubr.bf16.vlgmr.msra.gmra.mrb[0].mxu1 %v108_v15 }
 0x10c   :  { %1437 = vmatpush1.bf16.msra.mxu0 %v5474_v13  ;;  %1601 = vmatpush1.bf16.msra.mxu1 %v5477_v14  ;;  %v5514_v14 = vld [vmem:[%s6400_s4 + $0xc8] sm:$0xff]  }
 0x10d   :  { %1468 = vmatprep.mubr.bf16.mxu0 %v6044_v18  ;;  %1632 = vmatprep.mubr.bf16.mxu1 %v6044_v18 }
 0x10e   :  { %4997 = vmatprep.subr.bf16.mxu1 %v5480_v16  ;;  %5041 = vmatprep.subr.bf16.mxu0 %v5482_v17  ;;  %v5515_v16 = vld [vmem:[%s6400_s4 + $0x88] sm:$0xff]   ;;  %v5516_v17 = vld [vmem:[%s6400_s4 + $0xd0] sm:$0xff]  }
 0x117   :  { %4666 = vmatmul.mubr.msk.bf16.vlgmr.msra.gmra.mrb[0].mxu0 %vm1309_vm0, %v110_v22  ;;  %4667 = vmatmul.mubr.msk.bf16.vlgmr.msra.gmra.mrb[0].mxu1 %vm1309_vm0, %v110_v22  ;;  %v5520_v22 = vld [vmem:[%s6400_s4 + $0xe0] sm:$0xff]  }
 0x118   :  { %4998 = vmatpush3.bf16.msra.mxu1 %v5481_v20  ;;  %5042 = vmatpush3.bf16.msra.mxu0 %v5483_v21  ;;  %v5518_v20 = vld [vmem:[%s6400_s4 + $0xd8] sm:$0xff]  }
 0x119   :  { %4999 = vmatprep.subr.bf16.mxu1 %v5484_v23  ;;  %5043 = vmatprep.subr.bf16.mxu0 %v5486_v24  ;;  %v5519_v21 = vld [vmem:[%s6400_s4 + $0x98] sm:$0xff]   ;;  %v5521_v23 = vld [vmem:[%s6400_s4 + $0xa0] sm:$0xff]   ;;  %v6285_v24 = vsub.s32 2, %v6239_v53 }
 0x11c   :  { %5000 = vmatpush3.bf16.msra.mxu1 %v5485_v25  ;;  %5044 = vmatpush3.bf16.msra.mxu0 %v5487_v26  ;;  %v5522_v25 = vld [vmem:[%s6400_s4 + $0xe8] sm:$0xff]  }
 0x11d   :  { %5001 = vmatprep.subr.bf16.mxu1 %v5488_v27  ;;  %5045 = vmatprep.subr.bf16.mxu0 %v5490_v28  ;;  %v5523_v26 = vld [vmem:[%s6400_s4 + $0xa8] sm:$0xff]   ;;  %v320_v27 = vrot.slane %v307_v55, %v6285_v24  ;;  %v5524_v28 = vld [vmem:[%s6400_s4 + $0xf0] sm:$0xff]  }
 0x11e   :  { %v5547_v55 = vld [vmem:[#allocation6 + $0x8] ss:$16 sps:$4 sm:$0xff]  }
 0x120   :  { %5002 = vmatpush3.bf16.msra.mxu1 %v5489_v29  ;;  %5046 = vmatpush3.bf16.msra.mxu0 %v5491_v30  ;;  %v5525_v29 = vld [vmem:[%s6400_s4 + $0xb0] sm:$0xff]  }
 0x121   :  { %5003 = vmatprep.subr.bf16.mxu1 %v5492_v31  ;;  %5047 = vmatprep.subr.bf16.mxu0 %v5494_v32  ;;  %v5526_v31 = vld [vmem:[%s6400_s4 + $0xf8] sm:$0xff]  }
 0x122   :  { %v5527_v32 = vld [vmem:[%s6400_s4 + $0xb8] sm:$0xff]  }
 0x124   :  { %5004 = vmatpush3.bf16.msra.mxu1 %v5493_v33  ;;  %5048 = vmatpush3.bf16.msra.mxu0 %v5495_v34  ;;  %v5528_v34 = vld [vmem:[#allocation4 + $0xc0] sm:$0xff]  }
 0x125   :  { %5005 = vmatprep.subr.bf16.mxu1 %v5496_v35  ;;  %5049 = vmatprep.subr.bf16.mxu0 %v5498_v36  ;;  %v5529_v35 = vld [vmem:[#allocation4 + $0x80] sm:$0xff]  }
 0x128   :  { %5006 = vmatpush3.bf16.msra.mxu1 %v5497_v37  ;;  %5050 = vmatpush3.bf16.msra.mxu0 %v5499_v38  ;;  %v5530_v37 = vld [vmem:[#allocation4 + $0xc8] sm:$0xff]  }
 0x129   :  { %5007 = vmatprep.subr.bf16.mxu1 %v5500_v39  ;;  %5051 = vmatprep.subr.bf16.mxu0 %v5502_v40  ;;  %v5531_v38 = vld [vmem:[#allocation4 + $0x88] sm:$0xff]   ;;  %v5532_v39 = vld [vmem:[#allocation4 + $0xd0] sm:$0xff]  }
 0x12a   :  { %v5533_v40 = vld [vmem:[#allocation4 + $0x90] sm:$0xff]  }
 0x12c   :  { %5008 = vmatpush3.bf16.msra.mxu1 %v5501_v41  ;;  %5052 = vmatpush3.bf16.msra.mxu0 %v5503_v42  ;;  %v5534_v41 = vld [vmem:[#allocation4 + $0xd8] sm:$0xff]  }
 0x12d   :  { %5009 = vmatprep.subr.bf16.mxu1 %v5504_v43  ;;  %5053 = vmatprep.subr.bf16.mxu0 %v5506_v45  ;;  %v5535_v42 = vld [vmem:[#allocation4 + $0x98] sm:$0xff]   ;;  %v5536_v43 = vld [vmem:[#allocation4 + $0xe0] sm:$0xff]   ;;  %v5538_v45 = vld [vmem:[#allocation4 + $0xe8] sm:$0xff]  }
 0x130   :  { %5010 = vmatpush3.bf16.msra.mxu1 %v5505_v44  ;;  %5054 = vmatpush3.bf16.msra.mxu0 %v5507_v46  ;;  %v5537_v44 = vld [vmem:[#allocation4 + $0xa0] sm:$0xff]   ;;  %v5539_v46 = vld [vmem:[#allocation4 + $0xa8] sm:$0xff]  }
 0x131   :  { %5011 = vmatprep.subr.bf16.mxu1 %v5508_v47  ;;  %5055 = vmatprep.subr.bf16.mxu0 %v5510_v49  ;;  %v5540_v47 = vld [vmem:[#allocation4 + $0xf0] sm:$0xff]   ;;  %v5542_v49 = vld [vmem:[#allocation4 + $0xf8] sm:$0xff]  }
 0x134   :  { %5012 = vmatpush3.bf16.msra.mxu1 %v5509_v48  ;;  %5056 = vmatpush3.bf16.msra.mxu0 %v5511_v50  ;;  %v5541_v48 = vld [vmem:[#allocation4 + $0xb0] sm:$0xff]   ;;  %v5543_v50 = vld [vmem:[#allocation4 + $0xb8] sm:$0xff]  }
 0x135   :  { %5019 = vmatprep.subr.bf16.mxu1 %v5512_v51  ;;  %v5544_v51 = vld [vmem:[#allocation6] ss:$16 sps:$4 sm:$0xff]   ;;  %2553 = vmatprep.subr.bf16.mxu0 %v5546_v52 }
 0x1ea   :  { %v1470_v61 = vpop.f32.mrb[0].mxu0  ;;  %v1634_v62 = vpop.f32.mrb[0].mxu1 }
 0x1eb   :  { %v5129_v63 = vadd.f32 %v1470_v61, %v312_v58  ;;  %v1472_v0 = vpop.f32.mrb[1].mxu0  ;;  %v1636_v1 = vpop.f32.mrb[1].mxu1  ;;  %v5131_v30 = vadd.f32 %v1634_v62, %v320_v27  ;;  %v5549_v58 = vld [vmem:[#allocation6 + $0xc] ss:$16 sps:$4 sm:$0xff]   ;;  %v5550_v61 = vld [vmem:[#allocation6 + $0x20] ss:$16 sps:$4 sm:$0xff]  }
 0x1ec   :  { %v5130_v2 = vadd.f32 %v1472_v0, %v316_v59  ;;  %v5132_v3 = vadd.f32 %v1636_v1, %v324_v60  ;;  %v1474_v4 = vpop.f32.mrb[2].mxu0  ;;  %v1638_v5 = vpop.f32.mrb[2].mxu1  ;;  %v5552_v59 = vld [vmem:[#allocation6 + $0x24] ss:$16 sps:$4 sm:$0xff]   ;;  %v5555_v60 = vld [vmem:[#allocation6 + $0x2c] ss:$16 sps:$4 sm:$0xff]  }
 0x1ed   :  { %v1641_v6 = vmax.f32 %v5129_v63, 0.0  ;;  %v1475_v7 = vpop.f32.mrb[3].mxu0  ;;  %v1639_v8 = vpop.f32.mrb[3].mxu1  ;;  %v1643_v33 = vmax.f32 %v5131_v30, 0.0  ;;  %v5553_v62 = vld [vmem:[#allocation6 + $0x28] ss:$16 sps:$4 sm:$0xff]  }
 0x1ee   :  { %v1642_v9 = vmax.f32 %v5130_v2, 0.0  ;;  %v1644_v10 = vmax.f32 %v5132_v3, 0.0  ;;  %v5558_v63 = vld [vmem:[#allocation6 + $0x44] ss:$16 sps:$4 sm:$0xff]   ;;  %v5561_v0 = vld [vmem:[#allocation6 + $0x4c] ss:$16 sps:$4 sm:$0xff]  }
 0x1ef   :  { %v1645_v13 = vpack.c.bf16 %v1641_v6, %v1641_v6  ;;  %v1647_v36 = vpack.c.bf16 %v1643_v33, %v1643_v33  ;;  %v5556_v1 = vld [vmem:[#allocation6 + $0x40] ss:$16 sps:$4 sm:$0xff]   ;;  %v5564_v2 = vld [vmem:[#allocation6 + $0x64] ss:$16 sps:$4 sm:$0xff]   ;;  %v5567_v3 = vld [vmem:[#allocation6 + $0x6c] ss:$16 sps:$4 sm:$0xff]  }
 0x1f0   :  { %v1646_v11 = vpack.c.bf16 %v1642_v9, %v1642_v9  ;;  %v1648_v15 = vpack.c.bf16 %v1644_v10, %v1644_v10  ;;  %v5562_v4 = vld [vmem:[#allocation6 + $0x60] ss:$16 sps:$4 sm:$0xff]   ;;  %v5565_v5 = vld [vmem:[#allocation6 + $0x68] ss:$16 sps:$4 sm:$0xff]   ;;  %v5570_v6 = vld [vmem:[#allocation6 + $0x84] ss:$16 sps:$4 sm:$0xff]  }
 0x1f1   :  { %v5573_v7 = vld [vmem:[#allocation6 + $0x8c] ss:$16 sps:$4 sm:$0xff]   ;;  %v5568_v8 = vld [vmem:[#allocation6 + $0x80] ss:$16 sps:$4 sm:$0xff]   ;;  %v5571_v9 = vld [vmem:[#allocation6 + $0x88] ss:$16 sps:$4 sm:$0xff]  }
 0x1f2   :  { %1944 = vmatprep.mubr.bf16.mxu1 %v1646_v11  ;;  %2287 = vmatprep.mubr.bf16.mxu0 %v1646_v11  ;;  %v5576_v10 = vld [vmem:[#allocation6 + $0xa4] ss:$16 sps:$4 sm:$0xff]   ;;  %v5579_v11 = vld [vmem:[#allocation6 + $0xac] ss:$16 sps:$4 sm:$0xff]  }
 0x1f3   :  { %1945 = vmatmul.mubr.bf16.vlgmr.msra.gmra.mrb[4].mxu1 %v1645_v13  ;;  %2288 = vmatmul.mubr.bf16.vlgmr.msra.gmra.mrb[4].mxu0 %v1645_v13  ;;  %v5577_v13 = vld [vmem:[#allocation6 + $0xa8] ss:$16 sps:$4 sm:$0xff]  }
 0x1f4   :  { %5020 = vmatpush3.bf16.msra.mxu1 %v5513_v12  ;;  %1984 = vmatprep.mubr.bf16.mxu1 %v1648_v15  ;;  %v5574_v12 = vld [vmem:[#allocation6 + $0xa0] ss:$16 sps:$4 sm:$0xff]  }
 0x1f5   :  { %5021 = vmatprep.subr.bf16.mxu1 %v5514_v14  ;;  %2585 = vmatprep.mubr.bf16.mxu0 %v6044_v18  ;;  %v5582_v14 = vld [vmem:[#allocation6 + $0xc4] ss:$16 sps:$4 sm:$0xff]  }
 0x1f6   :  { %2554 = vmatpush1.bf16.msra.mxu0 %v5544_v51 }
 0x1f7   :  { %2555 = vmatprep.subr.bf16.mxu0 %v5552_v59  ;;  %v5592_v59 = vld [vmem:[#allocation7] ss:$28 sps:$4 sm:$0xff]  }
 0x1f8   :  { %5022 = vmatpush3.bf16.msra.mxu1 %v5515_v16  ;;  %v5580_v16 = vld [vmem:[#allocation6 + $0xc0] ss:$16 sps:$4 sm:$0xff]  }
 0x1f9   :  { %5023 = vmatprep.subr.bf16.mxu1 %v5516_v17  ;;  %v5583_v17 = vld [vmem:[#allocation6 + $0xc8] ss:$16 sps:$4 sm:$0xff]  }
 0x1fa   :  { %2556 = vmatpush1.bf16.msra.mxu0 %v5550_v61 }
 0x1fb   :  { %2557 = vmatprep.subr.bf16.mxu0 %v5558_v63  ;;  %v5603_v63 = vld [vmem:[#allocation7 + $0x44] ss:$28 sps:$4 sm:$0xff]  }
 0x1fc   :  { %5024 = vmatpush3.bf16.msra.mxu1 %v5517_v19  ;;  %v5588_v19 = vld [vmem:[#allocation6 + $0xe4] ss:$16 sps:$4 sm:$0xff]  }
 0x1fd   :  { %5025 = vmatprep.subr.bf16.mxu1 %v5518_v20  ;;  %v5591_v20 = vld [vmem:[#allocation6 + $0xec] ss:$16 sps:$4 sm:$0xff]  }
 0x1fe   :  { %2558 = vmatpush1.bf16.msra.mxu0 %v5556_v1  ;;  %v5601_v1 = vld [vmem:[#allocation7 + $0x40] ss:$28 sps:$4 sm:$0xff]  }
 0x1ff   :  { %2559 = vmatprep.subr.bf16.mxu0 %v5564_v2  ;;  %v5609_v2 = vld [vmem:[#allocation7 + $0x7c] ss:$28 sps:$4 sm:$0xff]  }
 0x200   :  { %5026 = vmatpush3.bf16.msra.mxu1 %v5519_v21  ;;  %v5586_v21 = vld [vmem:[#allocation6 + $0xe0] ss:$16 sps:$4 sm:$0xff]  }
 0x201   :  { %5027 = vmatprep.subr.bf16.mxu1 %v5520_v22  ;;  %v5589_v22 = vld [vmem:[#allocation6 + $0xe8] ss:$16 sps:$4 sm:$0xff]  }
 0x202   :  { %2560 = vmatpush1.bf16.msra.mxu0 %v5562_v4  ;;  %v5607_v4 = vld [vmem:[#allocation7 + $0x78] ss:$28 sps:$4 sm:$0xff]  }
 0x203   :  { %2561 = vmatprep.subr.bf16.mxu0 %v5570_v6  ;;  %v5615_v6 = vld [vmem:[#allocation7 + $0xb4] ss:$28 sps:$4 sm:$0xff]  }
 0x204   :  { %5028 = vmatpush3.bf16.msra.mxu1 %v5521_v23  ;;  %v5594_v23 = vld [vmem:[#allocation7 + $0x4] ss:$28 sps:$4 sm:$0xff]  }
 0x205   :  { %5029 = vmatprep.subr.bf16.mxu1 %v5522_v25  ;;  %v5597_v25 = vld [vmem:[#allocation7 + $0xc] ss:$28 sps:$4 sm:$0xff]  }
 0x206   :  { %2562 = vmatpush1.bf16.msra.mxu0 %v5568_v8  ;;  %v5613_v8 = vld [vmem:[#allocation7 + $0xb0] ss:$28 sps:$4 sm:$0xff]  }
 0x207   :  { %2563 = vmatprep.subr.bf16.mxu0 %v5576_v10  ;;  %v5621_v10 = vld [vmem:[#allocation7 + $0xec] ss:$28 sps:$4 sm:$0xff]  }
 0x208   :  { %5030 = vmatpush3.bf16.msra.mxu1 %v5523_v26 }
 0x209   :  { %5031 = vmatprep.subr.bf16.mxu1 %v5524_v28 }
 0x20a   :  { %2564 = vmatpush1.bf16.msra.mxu0 %v5574_v12  ;;  %v5619_v12 = vld [vmem:[#allocation7 + $0xe8] ss:$28 sps:$4 sm:$0xff]  }
 0x20b   :  { %2565 = vmatprep.subr.bf16.mxu0 %v5582_v14  ;;  %v5627_v14 = vld [vmem:[#allocation7 + $0x124] ss:$28 sps:$4 sm:$0xff]  }
 0x20c   :  { %5032 = vmatpush3.bf16.msra.mxu1 %v5525_v29 }
 0x20d   :  { %5033 = vmatprep.subr.bf16.mxu1 %v5526_v31 }
 0x20e   :  { %2566 = vmatpush1.bf16.msra.mxu0 %v5580_v16  ;;  %v5625_v16 = vld [vmem:[#allocation7 + $0x120] ss:$28 sps:$4 sm:$0xff]  }
 0x20f   :  { %2567 = vmatprep.subr.bf16.mxu0 %v5588_v19  ;;  %v5633_v19 = vld [vmem:[#allocation7 + $0x15c] ss:$28 sps:$4 sm:$0xff]  }
 0x210   :  { %5034 = vmatpush3.bf16.msra.mxu1 %v5527_v32 }
 0x211   :  { %5063 = vmatprep.subr.bf16.mxu1 %v5528_v34 }
 0x212   :  { %2568 = vmatpush1.bf16.msra.mxu0 %v5586_v21  ;;  %v5631_v21 = vld [vmem:[#allocation7 + $0x158] ss:$28 sps:$4 sm:$0xff]  }
 0x213   :  { %1985 = vmatmul.mubr.bf16.vlgmr.msra.gmra.mrb[8].mxu1 %v1647_v36  ;;  %4088 = vmatprep.subr.bf16.mxu0 %v5594_v23  ;;  %v5639_v23 = vld [vmem:[#allocation7 + $0x194] ss:$28 sps:$4 sm:$0xff]  }
 0x214   :  { %5064 = vmatpush3.bf16.msra.mxu1 %v5529_v35  ;;  %2327 = vmatprep.mubr.bf16.mxu1 %v1648_v15  ;;  %v5585_v15 = vld [vmem:[#allocation6 + $0xcc] ss:$16 sps:$4 sm:$0xff]  }
 0x215   :  { %5065 = vmatprep.subr.bf16.mxu1 %v5530_v37 }
 0x218   :  { %5066 = vmatpush3.bf16.msra.mxu1 %v5531_v38 }
 0x219   :  { %5067 = vmatprep.subr.bf16.mxu1 %v5532_v39 }
 0x21c   :  { %5068 = vmatpush3.bf16.msra.mxu1 %v5533_v40 }
 0x21d   :  { %5069 = vmatprep.subr.bf16.mxu1 %v5534_v41 }
 0x220   :  { %5070 = vmatpush3.bf16.msra.mxu1 %v5535_v42 }
 0x221   :  { %5071 = vmatprep.subr.bf16.mxu1 %v5536_v43 }
 0x224   :  { %5072 = vmatpush3.bf16.msra.mxu1 %v5537_v44  ;;  %v4701_v44 = vld [vmem:[%s6403_s7] ss:$0 sm:$0xff] }
 0x225   :  { %5073 = vmatprep.subr.bf16.mxu1 %v5538_v45 }
 0x228   :  { %5074 = vmatpush3.bf16.msra.mxu1 %v5539_v46 }
 0x229   :  { %5075 = vmatprep.subr.bf16.mxu1 %v5540_v47 }
 0x22c   :  { %5076 = vmatpush3.bf16.msra.mxu1 %v5541_v48 }
 0x22d   :  { %5077 = vmatprep.subr.bf16.mxu1 %v5542_v49 }
 0x230   :  { %5078 = vmatpush3.bf16.msra.mxu1 %v5543_v50  ;;  %v2335_v50 = vld [vmem:[%s6397_s1] sm:$0xff] }
 0x231   :  { %2594 = vmatprep.subr.bf16.mxu1 %v5549_v58 }
 0x233   :  { %2328 = vmatmul.mubr.bf16.vlgmr.msra.gmra.mrb[12].mxu1 %v1647_v36  ;;  %v4668_v36 = vld [vmem:[%s6401_s5] ss:$0 sm:$0xff] }
 0x234   :  { %2626 = vmatprep.mubr.bf16.mxu1 %v6044_v18  ;;  %2595 = vmatpush1.bf16.msra.mxu1 %v5547_v55  ;;  %v5559_v18 = vld [vmem:[#allocation6 + $0x48] ss:$16 sps:$4 sm:$0xff]  }
 0x235   :  { %2596 = vmatprep.subr.bf16.mxu1 %v5555_v60  ;;  %v5595_v60 = vld [vmem:[#allocation7 + $0x8] ss:$28 sps:$4 sm:$0xff]  }
 0x238   :  { %2597 = vmatpush1.bf16.msra.mxu1 %v5553_v62  ;;  %v5600_v62 = vld [vmem:[#allocation7 + $0x3c] ss:$28 sps:$4 sm:$0xff]  }
 0x239   :  { %2598 = vmatprep.subr.bf16.mxu1 %v5561_v0  ;;  %v5598_v0 = vld [vmem:[#allocation7 + $0x38] ss:$28 sps:$4 sm:$0xff]  }
 0x23c   :  { %2599 = vmatpush1.bf16.msra.mxu1 %v5559_v18  ;;  %v5606_v18 = vld [vmem:[#allocation7 + $0x74] ss:$28 sps:$4 sm:$0xff]  }
 0x23d   :  { %2600 = vmatprep.subr.bf16.mxu1 %v5567_v3  ;;  %v5604_v3 = vld [vmem:[#allocation7 + $0x70] ss:$28 sps:$4 sm:$0xff]  }
 0x240   :  { %2601 = vmatpush1.bf16.msra.mxu1 %v5565_v5  ;;  %v5612_v5 = vld [vmem:[#allocation7 + $0xac] ss:$28 sps:$4 sm:$0xff]  }
 0x241   :  { %2602 = vmatprep.subr.bf16.mxu1 %v5573_v7  ;;  %v5610_v7 = vld [vmem:[#allocation7 + $0xa8] ss:$28 sps:$4 sm:$0xff]  }
 0x244   :  { %2603 = vmatpush1.bf16.msra.mxu1 %v5571_v9  ;;  %v5618_v9 = vld [vmem:[#allocation7 + $0xe4] ss:$28 sps:$4 sm:$0xff]  }
 0x245   :  { %2604 = vmatprep.subr.bf16.mxu1 %v5579_v11  ;;  %v5616_v11 = vld [vmem:[#allocation7 + $0xe0] ss:$28 sps:$4 sm:$0xff]  }
 0x248   :  { %2605 = vmatpush1.bf16.msra.mxu1 %v5577_v13  ;;  %v5624_v13 = vld [vmem:[#allocation7 + $0x11c] ss:$28 sps:$4 sm:$0xff]  }
 0x249   :  { %2606 = vmatprep.subr.bf16.mxu1 %v5585_v15  ;;  %v5622_v15 = vld [vmem:[#allocation7 + $0x118] ss:$28 sps:$4 sm:$0xff]  }
 0x24c   :  { %2607 = vmatpush1.bf16.msra.mxu1 %v5583_v17  ;;  %v5630_v17 = vld [vmem:[#allocation7 + $0x154] ss:$28 sps:$4 sm:$0xff]  }
 0x24d   :  { %2608 = vmatprep.subr.bf16.mxu1 %v5591_v20  ;;  %v5628_v20 = vld [vmem:[#allocation7 + $0x150] ss:$28 sps:$4 sm:$0xff]  }
 0x250   :  { %2609 = vmatpush1.bf16.msra.mxu1 %v5589_v22  ;;  %v5636_v22 = vld [vmem:[#allocation7 + $0x18c] ss:$28 sps:$4 sm:$0xff]  }
 0x251   :  { %4170 = vmatprep.subr.bf16.mxu1 %v5597_v25  ;;  %v5634_v25 = vld [vmem:[#allocation7 + $0x188] ss:$28 sps:$4 sm:$0xff]  }
 0x2c6   :  { %v5013_v26 = vpop.f32.mrb[4].mxu1  ;;  %v5057_v27 = vpop.f32.mrb[4].mxu0 }
 0x2c7   :  { %v5014_v28 = vpop.f32.mrb[5].mxu1  ;;  %v5058_v29 = vpop.f32.mrb[5].mxu0 }
 0x2c8   :  { %v5015_v30 = vadd.f32 %v5014_v28, %v5013_v26  ;;  %v5059_v31 = vadd.f32 %v5058_v29, %v5057_v27  ;;  %v5016_v32 = vpop.f32.mrb[6].mxu1  ;;  %v5060_v33 = vpop.f32.mrb[6].mxu0  ;;  %v5637_v26 = vld [vmem:[#allocation7 + $0x190] ss:$28 sps:$4 sm:$0xff]   ;;  %v5642_v27 = vld [vmem:[#allocation7 + $0x1c4] ss:$28 sps:$4 sm:$0xff]  }
 0x2c9   :  { %v5017_v34 = vpop.f32.mrb[7].mxu1  ;;  %v5061_v35 = vpop.f32.mrb[7].mxu0  ;;  %v5645_v28 = vld [vmem:[#allocation7 + $0x1cc] ss:$28 sps:$4 sm:$0xff]   ;;  %v5640_v29 = vld [vmem:[#allocation7 + $0x1c0] ss:$28 sps:$4 sm:$0xff]  }
 0x2ca   :  { %v1947_v39 = vadd.f32 %v5015_v30, %v4668_v36  ;;  %v2290_v47 = vadd.f32 %v5059_v31, %v4701_v44  ;;  %v5643_v30 = vld [vmem:[#allocation7 + $0x1c8] ss:$28 sps:$4 sm:$0xff]   ;;  %v5648_v31 = vld [vmem:[#allocation7 + $0x1fc] ss:$28 sps:$4 sm:$0xff]   ;;  %v5654_v35 = vld [vmem:[#allocation7 + $0x234] ss:$28 sps:$4 sm:$0xff]  }
 0x2cb   :  { %v5651_v32 = vld [vmem:[#allocation7 + $0x204] ss:$28 sps:$4 sm:$0xff]   ;;  %v5646_v33 = vld [vmem:[#allocation7 + $0x1f8] ss:$28 sps:$4 sm:$0xff]   ;;  %v5669_v44 = vld [vmem:[#allocation7 + $0x2ac] ss:$28 sps:$4 sm:$0xff]  }
 0x2cc   :  { %v5649_v34 = vld [vmem:[#allocation7 + $0x200] ss:$28 sps:$4 sm:$0xff]  }
 0x2cd   :  { %v5657_v36 = vld [vmem:[#allocation7 + $0x23c] ss:$28 sps:$4 sm:$0xff]  }
 0x2e6   :  { %v5035_v37 = vpop.f32.mrb[8].mxu1 }
 0x2e7   :  { %v5036_v38 = vpop.f32.mrb[9].mxu1 }
 0x2e8   :  { %v5037_v40 = vadd.f32 %v5036_v38, %v5035_v37  ;;  %v5038_v41 = vpop.f32.mrb[10].mxu1  ;;  %v5652_v37 = vld [vmem:[#allocation7 + $0x230] ss:$28 sps:$4 sm:$0xff]   ;;  %v5655_v38 = vld [vmem:[#allocation7 + $0x238] ss:$28 sps:$4 sm:$0xff]  }
 0x2e9   :  { %v5039_v42 = vpop.f32.mrb[11].mxu1  ;;  %v5658_v41 = vld [vmem:[#allocation7 + $0x268] ss:$28 sps:$4 sm:$0xff]  }
 0x2ea   :  { %v1987_v43 = vadd.f32 %v5037_v40, %v1947_v39  ;;  %v5660_v39 = vld [vmem:[#allocation7 + $0x26c] ss:$28 sps:$4 sm:$0xff]   ;;  %v5663_v40 = vld [vmem:[#allocation7 + $0x274] ss:$28 sps:$4 sm:$0xff]  }
 0x2eb   :  { %v5661_v42 = vld [vmem:[#allocation7 + $0x270] ss:$28 sps:$4 sm:$0xff]  }
 0x306   :  { %v5079_v45 = vpop.f32.mrb[12].mxu1 }
 0x307   :  { %v5080_v46 = vpop.f32.mrb[13].mxu1 }
 0x308   :  { %v5081_v48 = vadd.f32 %v5080_v46, %v5079_v45  ;;  %v5082_v49 = vpop.f32.mrb[14].mxu1  ;;  %v5664_v45 = vld [vmem:[#allocation7 + $0x2a0] ss:$28 sps:$4 sm:$0xff]   ;;  %v5667_v46 = vld [vmem:[#allocation7 + $0x2a8] ss:$28 sps:$4 sm:$0xff]  }
 0x309   :  { %v5083_v51 = vpop.f32.mrb[15].mxu1  ;;  %v5670_v49 = vld [vmem:[#allocation7 + $0x2d8] ss:$28 sps:$4 sm:$0xff]  }
 0x30a   :  { %v2330_v52 = vadd.f32 %v5081_v48, %v2290_v47  ;;  %v5672_v47 = vld [vmem:[#allocation7 + $0x2dc] ss:$28 sps:$4 sm:$0xff]   ;;  %v5675_v48 = vld [vmem:[#allocation7 + $0x2e4] ss:$28 sps:$4 sm:$0xff]   ;;  %v5678_v51 = vld [vmem:[#allocation7 + $0x314] ss:$28 sps:$4 sm:$0xff]  }
 0x30c   :  { %v2336_v55 = vmul.f32 %v2335_v50, %v2330_v52  ;;  %v5673_v50 = vld [vmem:[#allocation7 + $0x2e0] ss:$28 sps:$4 sm:$0xff]  }
 0x30d   :  { %v5681_v52 = vld [vmem:[#allocation7 + $0x31c] ss:$28 sps:$4 sm:$0xff]  }
 0x30e   :  { %v2337_v58 = vadd.f32 %v2336_v55, %v1987_v43  ;;  %v5666_v43 = vld [vmem:[#allocation7 + $0x2a4] ss:$28 sps:$4 sm:$0xff]   ;;  %v5676_v55 = vld [vmem:[#allocation7 + $0x310] ss:$28 sps:$4 sm:$0xff]  }
 0x310   :  { %v2338_v61 = vpack.c.bf16 %v2337_v58, %v2337_v58  ;;  %v5679_v58 = vld [vmem:[#allocation7 + $0x318] ss:$28 sps:$4 sm:$0xff]  }
 0x312   :  { %2586 = vmatmul.mubr.bf16.vlgmr.msra.gmra.mrb[8].mxu0 %v2338_v61  ;;  %2627 = vmatmul.mubr.bf16.vlgmr.msra.gmra.mrb[16].mxu1 %v2338_v61  ;;  %v5682_v61 = vld [vmem:[#allocation7 + $0x348] ss:$28 sps:$4 sm:$0xff]  }
 0x313   :  { %4089 = vmatpush1.bf16.msra.mxu0 %v5592_v59  ;;  %4171 = vmatpush1.bf16.msra.mxu1 %v5595_v60  ;;  %v5684_v59 = vld [vmem:[#allocation7 + $0x34c] ss:$28 sps:$4 sm:$0xff]   ;;  %v5687_v60 = vld [vmem:[#allocation7 + $0x354] ss:$28 sps:$4 sm:$0xff]  }
 0x314   :  { %4090 = vmatprep.subr.bf16.mxu0 %v5600_v62  ;;  %4172 = vmatprep.subr.bf16.mxu1 %v5603_v63  ;;  %v5685_v62 = vld [vmem:[#allocation7 + $0x350] ss:$28 sps:$4 sm:$0xff]   ;;  %v5690_v63 = vld [vmem:[#allocation7 + $0x384] ss:$28 sps:$4 sm:$0xff]  }
 0x317   :  { %4091 = vmatpush1.bf16.msra.mxu0 %v5598_v0  ;;  %4173 = vmatpush1.bf16.msra.mxu1 %v5601_v1  ;;  %v5693_v0 = vld [vmem:[#allocation7 + $0x38c] ss:$28 sps:$4 sm:$0xff]   ;;  %v6319_v1 = vld [vmem:[%s6405_s9] sm:$0xf] }
 0x318   :  { %4092 = vmatprep.subr.bf16.mxu0 %v5606_v18  ;;  %4174 = vmatprep.subr.bf16.mxu1 %v5609_v2  ;;  %v2376_v18 = vrot.slane %v6319_v1, %v6242_v54  ;;  %v2380_v2 = vrot.slane %v6319_v1, %v6248_v56 }
 0x31b   :  { %4093 = vmatpush1.bf16.msra.mxu0 %v5604_v3  ;;  %4175 = vmatpush1.bf16.msra.mxu1 %v5607_v4  ;;  %v2388_v3 = vrot.slane %v6319_v1, %v6251_v57 }
 0x31c   :  { %4094 = vmatprep.subr.bf16.mxu0 %v5612_v5  ;;  %4176 = vmatprep.subr.bf16.mxu1 %v5615_v6 }
 0x31f   :  { %4095 = vmatpush1.bf16.msra.mxu0 %v5610_v7  ;;  %4177 = vmatpush1.bf16.msra.mxu1 %v5613_v8 }
 0x320   :  { %4096 = vmatprep.subr.bf16.mxu0 %v5618_v9  ;;  %4178 = vmatprep.subr.bf16.mxu1 %v5621_v10 }
 0x323   :  { %4097 = vmatpush1.bf16.msra.mxu0 %v5616_v11  ;;  %4179 = vmatpush1.bf16.msra.mxu1 %v5619_v12 }
 0x324   :  { %4098 = vmatprep.subr.bf16.mxu0 %v5624_v13  ;;  %4180 = vmatprep.subr.bf16.mxu1 %v5627_v14 }
 0x327   :  { %4099 = vmatpush1.bf16.msra.mxu0 %v5622_v15  ;;  %4181 = vmatpush1.bf16.msra.mxu1 %v5625_v16 }
 0x328   :  { %4100 = vmatprep.subr.bf16.mxu0 %v5630_v17  ;;  %4182 = vmatprep.subr.bf16.mxu1 %v5633_v19 }
 0x32b   :  { %4101 = vmatpush1.bf16.msra.mxu0 %v5628_v20  ;;  %4183 = vmatpush1.bf16.msra.mxu1 %v5631_v21  ;;  %v5688_v20 = vld [vmem:[#allocation7 + $0x380] ss:$28 sps:$4 sm:$0xff]   ;;  %v5691_v21 = vld [vmem:[#allocation7 + $0x388] ss:$28 sps:$4 sm:$0xff]  }
 0x32c   :  { %4102 = vmatprep.subr.bf16.mxu0 %v5636_v22  ;;  %4184 = vmatprep.subr.bf16.mxu1 %v5639_v23  ;;  %v5696_v23 = vld [vmem:[#allocation7 + $0x3bc] ss:$28 sps:$4 sm:$0xff]  }
 0x32f   :  { %4103 = vmatpush1.bf16.msra.mxu0 %v5634_v25  ;;  %4185 = vmatpush1.bf16.msra.mxu1 %v5637_v26  ;;  %v5699_v25 = vld [vmem:[#allocation7 + $0x3c4] ss:$28 sps:$4 sm:$0xff]  }
 0x330   :  { %4104 = vmatprep.subr.bf16.mxu0 %v5642_v27  ;;  %4186 = vmatprep.subr.bf16.mxu1 %v5645_v28  ;;  %v5694_v27 = vld [vmem:[#allocation7 + $0x3b8] ss:$28 sps:$4 sm:$0xff]   ;;  %v5697_v28 = vld [vmem:[#allocation7 + $0x3c0] ss:$28 sps:$4 sm:$0xff]  }
 0x333   :  { %4105 = vmatpush1.bf16.msra.mxu0 %v5640_v29  ;;  %4187 = vmatpush1.bf16.msra.mxu1 %v5643_v30  ;;  %v5702_v29 = vld [vmem:[#allocation7 + $0x3f4] ss:$28 sps:$4 sm:$0xff]   ;;  %v5705_v30 = vld [vmem:[#allocation7 + $0x3fc] ss:$28 sps:$4 sm:$0xff]  }
 0x334   :  { %4106 = vmatprep.subr.bf16.mxu0 %v5648_v31  ;;  %4188 = vmatprep.subr.bf16.mxu1 %v5651_v32  ;;  %v5700_v31 = vld [vmem:[#allocation7 + $0x3f0] ss:$28 sps:$4 sm:$0xff]   ;;  %v5703_v32 = vld [vmem:[#allocation7 + $0x3f8] ss:$28 sps:$4 sm:$0xff]  }
 0x337   :  { %4107 = vmatpush1.bf16.msra.mxu0 %v5646_v33  ;;  %4189 = vmatpush1.bf16.msra.mxu1 %v5649_v34  ;;  %v5708_v33 = vld [vmem:[#allocation7 + $0x42c] ss:$28 sps:$4 sm:$0xff]   ;;  %v5711_v34 = vld [vmem:[#allocation7 + $0x434] ss:$28 sps:$4 sm:$0xff]  }
 0x338   :  { %4108 = vmatprep.subr.bf16.mxu0 %v5654_v35  ;;  %4190 = vmatprep.subr.bf16.mxu1 %v5657_v36  ;;  %v5706_v35 = vld [vmem:[#allocation7 + $0x428] ss:$28 sps:$4 sm:$0xff]   ;;  %v5709_v36 = vld [vmem:[#allocation7 + $0x430] ss:$28 sps:$4 sm:$0xff]  }
 0x33b   :  { %4109 = vmatpush1.bf16.msra.mxu0 %v5652_v37  ;;  %4191 = vmatpush1.bf16.msra.mxu1 %v5655_v38  ;;  %v5714_v37 = vld [vmem:[#allocation7 + $0x464] ss:$28 sps:$4 sm:$0xff]   ;;  %v5717_v38 = vld [vmem:[#allocation7 + $0x46c] ss:$28 sps:$4 sm:$0xff]  }
 0x33c   :  { %4110 = vmatprep.subr.bf16.mxu0 %v5660_v39  ;;  %4192 = vmatprep.subr.bf16.mxu1 %v5663_v40  ;;  %v5712_v39 = vld [vmem:[#allocation7 + $0x460] ss:$28 sps:$4 sm:$0xff]   ;;  %v5715_v40 = vld [vmem:[#allocation7 + $0x468] ss:$28 sps:$4 sm:$0xff]  }
 0x33f   :  { %4111 = vmatpush1.bf16.msra.mxu0 %v5658_v41  ;;  %4193 = vmatpush1.bf16.msra.mxu1 %v5661_v42  ;;  %v5720_v41 = vld [vmem:[#allocation7 + $0x49c] ss:$28 sps:$4 sm:$0xff]   ;;  %v5723_v42 = vld [vmem:[#allocation7 + $0x4a4] ss:$28 sps:$4 sm:$0xff]  }
 0x340   :  { %4112 = vmatprep.subr.bf16.mxu0 %v5666_v43  ;;  %4194 = vmatprep.subr.bf16.mxu1 %v5669_v44  ;;  %v5718_v43 = vld [vmem:[#allocation7 + $0x498] ss:$28 sps:$4 sm:$0xff]   ;;  %v5721_v44 = vld [vmem:[#allocation7 + $0x4a0] ss:$28 sps:$4 sm:$0xff]  }
 0x343   :  { %4113 = vmatpush1.bf16.msra.mxu0 %v5664_v45  ;;  %4195 = vmatpush1.bf16.msra.mxu1 %v5667_v46  ;;  %v5726_v45 = vld [vmem:[#allocation7 + $0x4d4] ss:$28 sps:$4 sm:$0xff]   ;;  %v5729_v46 = vld [vmem:[#allocation7 + $0x4dc] ss:$28 sps:$4 sm:$0xff]  }
 0x344   :  { %4114 = vmatprep.subr.bf16.mxu0 %v5672_v47  ;;  %4196 = vmatprep.subr.bf16.mxu1 %v5675_v48  ;;  %v5724_v47 = vld [vmem:[#allocation7 + $0x4d0] ss:$28 sps:$4 sm:$0xff]   ;;  %v5727_v48 = vld [vmem:[#allocation7 + $0x4d8] ss:$28 sps:$4 sm:$0xff]  }
 0x347   :  { %4115 = vmatpush1.bf16.msra.mxu0 %v5670_v49  ;;  %4197 = vmatpush1.bf16.msra.mxu1 %v5673_v50  ;;  %v5732_v49 = vld [vmem:[#allocation7 + $0x50c] ss:$28 sps:$4 sm:$0xff]   ;;  %v5735_v50 = vld [vmem:[#allocation7 + $0x514] ss:$28 sps:$4 sm:$0xff]  }
 0x348   :  { %4116 = vmatprep.subr.bf16.mxu0 %v5678_v51  ;;  %4198 = vmatprep.subr.bf16.mxu1 %v5681_v52  ;;  %v5730_v51 = vld [vmem:[#allocation7 + $0x508] ss:$28 sps:$4 sm:$0xff]   ;;  %v5733_v52 = vld [vmem:[#allocation7 + $0x510] ss:$28 sps:$4 sm:$0xff]  }
 0x34b   :  { %4117 = vmatpush1.bf16.msra.mxu0 %v5676_v55  ;;  %4199 = vmatpush1.bf16.msra.mxu1 %v5679_v58  ;;  %v5738_v55 = vld [vmem:[#allocation7 + $0x544] ss:$28 sps:$4 sm:$0xff]   ;;  %v5741_v58 = vld [vmem:[#allocation7 + $0x54c] ss:$28 sps:$4 sm:$0xff]  }
 0x34c   :  { %4118 = vmatprep.subr.bf16.mxu0 %v5684_v59  ;;  %4200 = vmatprep.subr.bf16.mxu1 %v5687_v60  ;;  %v5736_v59 = vld [vmem:[#allocation7 + $0x540] ss:$28 sps:$4 sm:$0xff]   ;;  %v5739_v60 = vld [vmem:[#allocation7 + $0x548] ss:$28 sps:$4 sm:$0xff]  }
 0x34f   :  { %4119 = vmatpush1.bf16.msra.mxu0 %v5682_v61  ;;  %4201 = vmatpush1.bf16.msra.mxu1 %v5685_v62  ;;  %v5744_v61 = vld [vmem:[#allocation7 + $0x57c] ss:$28 sps:$4 sm:$0xff]   ;;  %v5747_v62 = vld [vmem:[#allocation7 + $0x584] ss:$28 sps:$4 sm:$0xff]  }
 0x350   :  { %4129 = vmatprep.subr.bf16.mxu0 %v5690_v63  ;;  %4211 = vmatprep.subr.bf16.mxu1 %v5693_v0  ;;  %v5742_v63 = vld [vmem:[#allocation7 + $0x578] ss:$28 sps:$4 sm:$0xff]   ;;  %v5745_v0 = vld [vmem:[#allocation7 + $0x580] ss:$28 sps:$4 sm:$0xff]  }
 0x3e5   :  { %v2587_v4 = vpop.f32.mrb[8].mxu0  ;;  %v6327_v5 = vpop.f32.mrb[16].mxu1 }
 0x3e6   :  { %v2588_v6 = vadd.f32 %v2587_v4, %v2376_v18  ;;  %v2589_v7 = vpop.f32.mrb[9].mxu0  ;;  %v2630_v8 = vpop.f32.mrb[17].mxu1  ;;  %v5750_v18 = vld [vmem:[#allocation7 + $0x5b4] ss:$28 sps:$4 sm:$0xff]  }
 0x3e7   :  { %v2590_v9 = vadd.f32 %v2589_v7, %v2380_v2  ;;  %v2631_v10 = vadd.f32 %v2630_v8, %v2388_v3  ;;  %v2591_v11 = vpop.f32.mrb[10].mxu0  ;;  %v2632_v12 = vpop.f32.mrb[18].mxu1  ;;  %v5753_v2 = vld [vmem:[#allocation7 + $0x5bc] ss:$28 sps:$4 sm:$0xff]   ;;  %v5748_v3 = vld [vmem:[#allocation7 + $0x5b0] ss:$28 sps:$4 sm:$0xff]  }
 0x3e8   :  { %v2635_v13 = vmax.f32 %v2588_v6, 0.0  ;;  %v2592_v14 = vpop.f32.mrb[11].mxu0  ;;  %v2633_v15 = vpop.f32.mrb[19].mxu1  ;;  %v5751_v4 = vld [vmem:[#allocation7 + $0x5b8] ss:$28 sps:$4 sm:$0xff]  }
 0x3e9   :  { %v2636_v16 = vmax.f32 %v2590_v9, 0.0  ;;  %v2638_v17 = vmax.f32 %v2631_v10, 0.0  ;;  %v5756_v6 = vld [vmem:[#allocation7 + $0x5ec] ss:$28 sps:$4 sm:$0xff]   ;;  %v5759_v7 = vld [vmem:[#allocation7 + $0x5f4] ss:$28 sps:$4 sm:$0xff]  }
 0x3ea   :  { %v6331_v22 = vpack.c.bf16 %v2635_v13, %v2635_v13  ;;  %v5754_v8 = vld [vmem:[#allocation7 + $0x5e8] ss:$28 sps:$4 sm:$0xff]   ;;  %v5757_v9 = vld [vmem:[#allocation7 + $0x5f0] ss:$28 sps:$4 sm:$0xff]   ;;  %v5760_v12 = vld [vmem:[#allocation7 + $0x620] ss:$28 sps:$4 sm:$0xff]  }
 0x3eb   :  { %v6329_v19 = vpack.c.bf16 %v2636_v16, %v2636_v16  ;;  %v6335_v26 = vpack.c.bf16 %v2638_v17, %v2638_v17  ;;  %v5762_v10 = vld [vmem:[#allocation7 + $0x624] ss:$28 sps:$4 sm:$0xff]   ;;  %v5765_v11 = vld [vmem:[#allocation7 + $0x62c] ss:$28 sps:$4 sm:$0xff]   ;;  %v5768_v14 = vld [vmem:[#allocation7 + $0x65c] ss:$28 sps:$4 sm:$0xff]  }
 0x3ec   :  { %v5763_v13 = vld [vmem:[#allocation7 + $0x628] ss:$28 sps:$4 sm:$0xff]   ;;  %v5766_v16 = vld [vmem:[#allocation7 + $0x658] ss:$28 sps:$4 sm:$0xff]   ;;  %v5769_v17 = vld [vmem:[#allocation7 + $0x660] ss:$28 sps:$4 sm:$0xff]  }
 0x3ed   :  { %4120 = vmatprep.mubr.bf16.mxu0 %v6329_v19  ;;  %4202 = vmatprep.mubr.bf16.mxu1 %v6329_v19  ;;  %v5771_v15 = vld [vmem:[#allocation7 + $0x664] ss:$28 sps:$4 sm:$0xff]  }
 0x3ee   :  { %4121 = vmatmul.mubr.bf16.vlgmr.msra.gmra.mrb[12].mxu0 %v6331_v22  ;;  %4203 = vmatmul.mubr.bf16.vlgmr.msra.gmra.mrb[20].mxu1 %v6331_v22 }
 0x3ef   :  { %4130 = vmatpush1.bf16.msra.mxu0 %v5688_v20  ;;  %4212 = vmatpush1.bf16.msra.mxu1 %v5691_v21  ;;  %v2384_v20 = vrot.slane %v6319_v1, %v6285_v24  ;;  %v5774_v21 = vld [vmem:[#allocation7 + $0x694] ss:$28 sps:$4 sm:$0xff]  }
 0x3f0   :  { %4161 = vmatprep.mubr.bf16.mxu0 %v6335_v26  ;;  %4243 = vmatprep.mubr.bf16.mxu1 %v6335_v26  ;;  %v5786_v1 = vld [vmem:[#allocation7 + $0x14] ss:$28 sps:$4 sm:$0xff]  }
 0x3f1   :  { %4131 = vmatprep.subr.bf16.mxu0 %v5696_v23  ;;  %4213 = vmatprep.subr.bf16.mxu1 %v5699_v25  ;;  %v5777_v23 = vld [vmem:[#allocation7 + $0x69c] ss:$28 sps:$4 sm:$0xff]   ;;  %v5772_v25 = vld [vmem:[#allocation7 + $0x690] ss:$28 sps:$4 sm:$0xff]  }
 0x3f3   :  { %4132 = vmatpush1.bf16.msra.mxu0 %v5694_v27  ;;  %4214 = vmatpush1.bf16.msra.mxu1 %v5697_v28  ;;  %v5775_v27 = vld [vmem:[#allocation7 + $0x698] ss:$28 sps:$4 sm:$0xff]   ;;  %v2629_v28 = vadd.f32 %v6327_v5, %v2384_v20  ;;  %v5842_v20 = vld [vmem:[#allocation7 + $0x600] ss:$28 sps:$4 sm:$0xff]  }
 0x3f4   :  { %4133 = vmatprep.subr.bf16.mxu0 %v5702_v29  ;;  %4215 = vmatprep.subr.bf16.mxu1 %v5705_v30  ;;  %v5780_v29 = vld [vmem:[#allocation7 + $0x6cc] ss:$28 sps:$4 sm:$0xff]   ;;  %v5783_v30 = vld [vmem:[#allocation7 + $0x6d4] ss:$28 sps:$4 sm:$0xff]  }
 0x3f5   :  { %v5788_v5 = vld [vmem:[#allocation7 + $0x18] ss:$28 sps:$4 sm:$0xff]  }
 0x3f7   :  { %4134 = vmatpush1.bf16.msra.mxu0 %v5700_v31  ;;  %4216 = vmatpush1.bf16.msra.mxu1 %v5703_v32  ;;  %v5778_v31 = vld [vmem:[#allocation7 + $0x6c8] ss:$28 sps:$4 sm:$0xff]   ;;  %v5781_v32 = vld [vmem:[#allocation7 + $0x6d0] ss:$28 sps:$4 sm:$0xff]  }
 0x3f8   :  { %4135 = vmatprep.subr.bf16.mxu0 %v5708_v33  ;;  %4217 = vmatprep.subr.bf16.mxu1 %v5711_v34  ;;  %v2637_v33 = vmax.f32 %v2629_v28, 0.0  ;;  %v5787_v34 = vld [vmem:[#allocation7 + $0x1d8] ss:$28 sps:$4 sm:$0xff]   ;;  %v5844_v28 = vld [vmem:[#allocation7 + $0x2b0] ss:$28 sps:$4 sm:$0xff]  }
 0x3fb   :  { %4136 = vmatpush1.bf16.msra.mxu0 %v5706_v35  ;;  %4218 = vmatpush1.bf16.msra.mxu1 %v5709_v36  ;;  %v5784_v35 = vld [vmem:[#allocation7 + $0x10] ss:$28 sps:$4 sm:$0xff]   ;;  %v6344_v36 = vpack.c.bf16 %v2637_v33, %v2637_v33 }
 0x3fc   :  { %4137 = vmatprep.subr.bf16.mxu0 %v5714_v37  ;;  %4219 = vmatprep.subr.bf16.mxu1 %v5717_v38  ;;  %v5791_v37 = vld [vmem:[#allocation7 + $0x4c] ss:$28 sps:$4 sm:$0xff]  }
 0x3fd   :  { %v5792_v38 = vld [vmem:[#allocation7 + $0x210] ss:$28 sps:$4 sm:$0xff]  }
 0x3fe   :  { %v5853_v33 = vld [vmem:[#allocation7 + $0x4b0] ss:$28 sps:$4 sm:$0xff]  }
 0x3ff   :  { %4138 = vmatpush1.bf16.msra.mxu0 %v5712_v39  ;;  %4220 = vmatpush1.bf16.msra.mxu1 %v5715_v40  ;;  %v5789_v39 = vld [vmem:[#allocation7 + $0x48] ss:$28 sps:$4 sm:$0xff]   ;;  %v5793_v40 = vld [vmem:[#allocation7 + $0x50] ss:$28 sps:$4 sm:$0xff]  }
 0x400   :  { %4139 = vmatprep.subr.bf16.mxu0 %v5720_v41  ;;  %4221 = vmatprep.subr.bf16.mxu1 %v5723_v42  ;;  %v5796_v41 = vld [vmem:[#allocation7 + $0x84] ss:$28 sps:$4 sm:$0xff]  }
 0x401   :  { %v5797_v42 = vld [vmem:[#allocation7 + $0x248] ss:$28 sps:$4 sm:$0xff]  }
 0x403   :  { %4140 = vmatpush1.bf16.msra.mxu0 %v5718_v43  ;;  %4222 = vmatpush1.bf16.msra.mxu1 %v5721_v44  ;;  %v5794_v43 = vld [vmem:[#allocation7 + $0x80] ss:$28 sps:$4 sm:$0xff]   ;;  %v5798_v44 = vld [vmem:[#allocation7 + $0x88] ss:$28 sps:$4 sm:$0xff]  }
 0x404   :  { %4141 = vmatprep.subr.bf16.mxu0 %v5726_v45  ;;  %4223 = vmatprep.subr.bf16.mxu1 %v5729_v46  ;;  %v5801_v45 = vld [vmem:[#allocation7 + $0xbc] ss:$28 sps:$4 sm:$0xff]  }
 0x405   :  { %v5802_v46 = vld [vmem:[#allocation7 + $0x280] ss:$28 sps:$4 sm:$0xff]  }
 0x407   :  { %4142 = vmatpush1.bf16.msra.mxu0 %v5724_v47  ;;  %4224 = vmatpush1.bf16.msra.mxu1 %v5727_v48  ;;  %v5799_v47 = vld [vmem:[#allocation7 + $0xb8] ss:$28 sps:$4 sm:$0xff]   ;;  %v5803_v48 = vld [vmem:[#allocation7 + $0xc0] ss:$28 sps:$4 sm:$0xff]  }
 0x408   :  { %4143 = vmatprep.subr.bf16.mxu0 %v5732_v49  ;;  %4225 = vmatprep.subr.bf16.mxu1 %v5735_v50  ;;  %v5806_v49 = vld [vmem:[#allocation7 + $0xf4] ss:$28 sps:$4 sm:$0xff]  }
 0x409   :  { %v5804_v50 = vld [vmem:[#allocation7 + $0xf0] ss:$28 sps:$4 sm:$0xff]  }
 0x40b   :  { %4144 = vmatpush1.bf16.msra.mxu0 %v5730_v51  ;;  %4226 = vmatpush1.bf16.msra.mxu1 %v5733_v52  ;;  %v5808_v51 = vld [vmem:[#allocation7 + $0xf8] ss:$28 sps:$4 sm:$0xff]   ;;  %v5811_v52 = vld [vmem:[#allocation7 + $0x12c] ss:$28 sps:$4 sm:$0xff]  }
 0x40c   :  { %4145 = vmatprep.subr.bf16.mxu0 %v5738_v55  ;;  %4227 = vmatprep.subr.bf16.mxu1 %v5741_v58  ;;  %v5812_v55 = vld [vmem:[#allocation7 + $0x2f0] ss:$28 sps:$4 sm:$0xff]   ;;  %v5809_v58 = vld [vmem:[#allocation7 + $0x128] ss:$28 sps:$4 sm:$0xff]  }
 0x40f   :  { %4146 = vmatpush1.bf16.msra.mxu0 %v5736_v59  ;;  %4228 = vmatpush1.bf16.msra.mxu1 %v5739_v60  ;;  %v5813_v59 = vld [vmem:[#allocation7 + $0x130] ss:$28 sps:$4 sm:$0xff]   ;;  %v5816_v60 = vld [vmem:[#allocation7 + $0x164] ss:$28 sps:$4 sm:$0xff]  }
 0x410   :  { %4147 = vmatprep.subr.bf16.mxu0 %v5744_v61  ;;  %4229 = vmatprep.subr.bf16.mxu1 %v5747_v62  ;;  %v5817_v61 = vld [vmem:[#allocation7 + $0x328] ss:$28 sps:$4 sm:$0xff]   ;;  %v5814_v62 = vld [vmem:[#allocation7 + $0x160] ss:$28 sps:$4 sm:$0xff]  }
 0x413   :  { %4148 = vmatpush1.bf16.msra.mxu0 %v5742_v63  ;;  %4230 = vmatpush1.bf16.msra.mxu1 %v5745_v0  ;;  %v5818_v63 = vld [vmem:[#allocation7 + $0x168] ss:$28 sps:$4 sm:$0xff]   ;;  %v5821_v0 = vld [vmem:[#allocation7 + $0x19c] ss:$28 sps:$4 sm:$0xff]  }
 0x414   :  { %4149 = vmatprep.subr.bf16.mxu0 %v5750_v18  ;;  %4231 = vmatprep.subr.bf16.mxu1 %v5753_v2  ;;  %v5822_v18 = vld [vmem:[#allocation7 + $0x360] ss:$28 sps:$4 sm:$0xff]   ;;  %v5819_v2 = vld [vmem:[#allocation7 + $0x198] ss:$28 sps:$4 sm:$0xff]  }
 0x417   :  { %4150 = vmatpush1.bf16.msra.mxu0 %v5748_v3  ;;  %4232 = vmatpush1.bf16.msra.mxu1 %v5751_v4  ;;  %v5823_v3 = vld [vmem:[#allocation7 + $0x1a0] ss:$28 sps:$4 sm:$0xff]   ;;  %v5826_v4 = vld [vmem:[#allocation7 + $0x1d4] ss:$28 sps:$4 sm:$0xff]  }
 0x418   :  { %4151 = vmatprep.subr.bf16.mxu0 %v5756_v6  ;;  %4233 = vmatprep.subr.bf16.mxu1 %v5759_v7  ;;  %v5827_v6 = vld [vmem:[#allocation7 + $0x558] ss:$28 sps:$4 sm:$0xff]   ;;  %v5824_v7 = vld [vmem:[#allocation7 + $0x1d0] ss:$28 sps:$4 sm:$0xff]  }
 0x41b   :  { %4152 = vmatpush1.bf16.msra.mxu0 %v5754_v8  ;;  %4234 = vmatpush1.bf16.msra.mxu1 %v5757_v9  ;;  %v5828_v8 = vld [vmem:[#allocation7 + $0x398] ss:$28 sps:$4 sm:$0xff]   ;;  %v5831_v9 = vld [vmem:[#allocation7 + $0x20c] ss:$28 sps:$4 sm:$0xff]  }
 0x41c   :  { %4153 = vmatprep.subr.bf16.mxu0 %v5762_v10  ;;  %4235 = vmatprep.subr.bf16.mxu1 %v5765_v11  ;;  %v5832_v10 = vld [vmem:[#allocation7 + $0x590] ss:$28 sps:$4 sm:$0xff]   ;;  %v5829_v11 = vld [vmem:[#allocation7 + $0x208] ss:$28 sps:$4 sm:$0xff]  }
 0x41f   :  { %4154 = vmatpush1.bf16.msra.mxu0 %v5760_v12  ;;  %4236 = vmatpush1.bf16.msra.mxu1 %v5763_v13  ;;  %v5833_v12 = vld [vmem:[#allocation7 + $0x3d0] ss:$28 sps:$4 sm:$0xff]   ;;  %v5836_v13 = vld [vmem:[#allocation7 + $0x244] ss:$28 sps:$4 sm:$0xff]  }
 0x420   :  { %4155 = vmatprep.subr.bf16.mxu0 %v5768_v14  ;;  %4237 = vmatprep.subr.bf16.mxu1 %v5771_v15  ;;  %v5837_v14 = vld [vmem:[#allocation7 + $0x5c8] ss:$28 sps:$4 sm:$0xff]   ;;  %v5834_v15 = vld [vmem:[#allocation7 + $0x240] ss:$28 sps:$4 sm:$0xff]  }
 0x423   :  { %4156 = vmatpush1.bf16.msra.mxu0 %v5766_v16  ;;  %4238 = vmatpush1.bf16.msra.mxu1 %v5769_v17  ;;  %v5838_v16 = vld [vmem:[#allocation7 + $0x408] ss:$28 sps:$4 sm:$0xff]   ;;  %v5841_v17 = vld [vmem:[#allocation7 + $0x27c] ss:$28 sps:$4 sm:$0xff]  }
 0x424   :  { %4157 = vmatprep.subr.bf16.mxu0 %v5774_v21  ;;  %4239 = vmatprep.subr.bf16.mxu1 %v5777_v23  ;;  %v5839_v21 = vld [vmem:[#allocation7 + $0x278] ss:$28 sps:$4 sm:$0xff]   ;;  %v5843_v23 = vld [vmem:[#allocation7 + $0x440] ss:$28 sps:$4 sm:$0xff]  }
 0x427   :  { %4158 = vmatpush1.bf16.msra.mxu0 %v5772_v25  ;;  %4240 = vmatpush1.bf16.msra.mxu1 %v5775_v27  ;;  %v5846_v25 = vld [vmem:[#allocation7 + $0x2b4] ss:$28 sps:$4 sm:$0xff]  }
 0x428   :  { %4159 = vmatprep.subr.bf16.mxu0 %v5780_v29  ;;  %4241 = vmatprep.subr.bf16.mxu1 %v5783_v30  ;;  %v5847_v27 = vld [vmem:[#allocation7 + $0x638] ss:$28 sps:$4 sm:$0xff]   ;;  %v5851_v30 = vld [vmem:[#allocation7 + $0x2ec] ss:$28 sps:$4 sm:$0xff]  }
 0x429   :  { %v5848_v29 = vld [vmem:[#allocation7 + $0x478] ss:$28 sps:$4 sm:$0xff]  }
 0x42b   :  { %4160 = vmatpush1.bf16.msra.mxu0 %v5778_v31  ;;  %4242 = vmatpush1.bf16.msra.mxu1 %v5781_v32  ;;  %v5852_v31 = vld [vmem:[#allocation7 + $0x670] ss:$28 sps:$4 sm:$0xff]   ;;  %v5849_v32 = vld [vmem:[#allocation7 + $0x2e8] ss:$28 sps:$4 sm:$0xff]  }
 0x42c   :  { %4252 = vmatprep.subr.bf16.mxu0 %v5786_v1  ;;  %5085 = vmatprep.subr.bf16.mxu1 %v5787_v34  ;;  %v5856_v1 = vld [vmem:[#allocation7 + $0x324] ss:$28 sps:$4 sm:$0xff]  }
 0x42d   :  { %v5857_v34 = vld [vmem:[#allocation7 + $0x6a8] ss:$28 sps:$4 sm:$0xff]  }
 0x42e   :  { %4162 = vmatmul.mubr.bf16.vlgmr.msra.gmra.mrb[12].mxu0 %v6344_v36  ;;  %4244 = vmatmul.mubr.bf16.vlgmr.msra.gmra.mrb[20].mxu1 %v6344_v36 }
 0x42f   :  { %4253 = vmatpush1.bf16.msra.mxu0 %v5784_v35  ;;  %4284 = vmatprep.mubr.bf16.mxu0 %v6329_v19  ;;  %v5854_v35 = vld [vmem:[#allocation7 + $0x320] ss:$28 sps:$4 sm:$0xff]  }
 0x430   :  { %5086 = vmatpush3.bf16.msra.mxu1 %v5788_v5  ;;  %4366 = vmatprep.mubr.bf16.mxu1 %v6329_v19  ;;  %v5807_v19 = vld [vmem:[#allocation7 + $0x2b8] ss:$28 sps:$4 sm:$0xff]   ;;  %v5858_v5 = vld [vmem:[#allocation7 + $0x4e8] ss:$28 sps:$4 sm:$0xff]  }
 0x431   :  { %4254 = vmatprep.subr.bf16.mxu0 %v5791_v37  ;;  %5087 = vmatprep.subr.bf16.mxu1 %v5792_v38  ;;  %v5861_v37 = vld [vmem:[#allocation7 + $0x35c] ss:$28 sps:$4 sm:$0xff]  }
 0x432   :  { %v5862_v38 = vld [vmem:[#allocation7 + $0x6e0] ss:$28 sps:$4 sm:$0xff]  }
 0x433   :  { %4255 = vmatpush1.bf16.msra.mxu0 %v5789_v39  ;;  %v5859_v39 = vld [vmem:[#allocation7 + $0x358] ss:$28 sps:$4 sm:$0xff]  }
 0x434   :  { %5088 = vmatpush3.bf16.msra.mxu1 %v5793_v40  ;;  %4256 = vmatprep.subr.bf16.mxu0 %v5796_v41  ;;  %v5863_v40 = vld [vmem:[#allocation7 + $0x520] ss:$28 sps:$4 sm:$0xff]   ;;  %v5866_v41 = vld [vmem:[#allocation7 + $0x394] ss:$28 sps:$4 sm:$0xff]  }
 0x435   :  { %5089 = vmatprep.subr.bf16.mxu1 %v5797_v42  ;;  %v5864_v42 = vld [vmem:[#allocation7 + $0x390] ss:$28 sps:$4 sm:$0xff]  }
 0x437   :  { %4257 = vmatpush1.bf16.msra.mxu0 %v5794_v43  ;;  %v5869_v43 = vld [vmem:[#allocation7 + $0x3cc] ss:$28 sps:$4 sm:$0xff]  }
 0x438   :  { %5090 = vmatpush3.bf16.msra.mxu1 %v5798_v44  ;;  %4258 = vmatprep.subr.bf16.mxu0 %v5801_v45  ;;  %v5867_v44 = vld [vmem:[#allocation7 + $0x3c8] ss:$28 sps:$4 sm:$0xff]  }
 0x439   :  { %5091 = vmatprep.subr.bf16.mxu1 %v5802_v46  ;;  %v5872_v45 = vld [vmem:[#allocation7 + $0x404] ss:$28 sps:$4 sm:$0xff]  }
 0x43a   :  { %v5870_v46 = vld [vmem:[#allocation7 + $0x400] ss:$28 sps:$4 sm:$0xff]  }
 0x43b   :  { %4259 = vmatpush1.bf16.msra.mxu0 %v5799_v47  ;;  %v5875_v47 = vld [vmem:[#allocation7 + $0x43c] ss:$28 sps:$4 sm:$0xff]  }
 0x43c   :  { %5092 = vmatpush3.bf16.msra.mxu1 %v5803_v48  ;;  %4260 = vmatprep.subr.bf16.mxu0 %v5806_v49  ;;  %v5873_v48 = vld [vmem:[#allocation7 + $0x438] ss:$28 sps:$4 sm:$0xff]  }
 0x43d   :  { %5093 = vmatprep.subr.bf16.mxu1 %v5807_v19  ;;  %v5878_v49 = vld [vmem:[#allocation7 + $0x474] ss:$28 sps:$4 sm:$0xff]  }
 0x43e   :  { %v5876_v19 = vld [vmem:[#allocation7 + $0x470] ss:$28 sps:$4 sm:$0xff]  }
 0x43f   :  { %4261 = vmatpush1.bf16.msra.mxu0 %v5804_v50  ;;  %v5879_v50 = vld [vmem:[#allocation7 + $0x4a8] ss:$28 sps:$4 sm:$0xff]  }
 0x440   :  { %5094 = vmatpush3.bf16.msra.mxu1 %v5808_v51  ;;  %4262 = vmatprep.subr.bf16.mxu0 %v5811_v52  ;;  %v5884_v51 = vld [vmem:[#allocation7 + $0x4e4] ss:$28 sps:$4 sm:$0xff]   ;;  %v5887_v52 = vld [vmem:[#allocation7 + $0x51c] ss:$28 sps:$4 sm:$0xff]  }
 0x441   :  { %5095 = vmatprep.subr.bf16.mxu1 %v5812_v55  ;;  %v5885_v55 = vld [vmem:[#allocation7 + $0x518] ss:$28 sps:$4 sm:$0xff]  }
 0x443   :  { %4263 = vmatpush1.bf16.msra.mxu0 %v5809_v58  ;;  %v5890_v58 = vld [vmem:[#allocation7 + $0x554] ss:$28 sps:$4 sm:$0xff]  }
 0x444   :  { %5096 = vmatpush3.bf16.msra.mxu1 %v5813_v59  ;;  %4264 = vmatprep.subr.bf16.mxu0 %v5816_v60  ;;  %v5888_v59 = vld [vmem:[#allocation7 + $0x550] ss:$28 sps:$4 sm:$0xff]  }
 0x445   :  { %5097 = vmatprep.subr.bf16.mxu1 %v5817_v61  ;;  %v5893_v60 = vld [vmem:[#allocation7 + $0x58c] ss:$28 sps:$4 sm:$0xff]  }
 0x446   :  { %v5891_v61 = vld [vmem:[#allocation7 + $0x588] ss:$28 sps:$4 sm:$0xff]  }
 0x447   :  { %4265 = vmatpush1.bf16.msra.mxu0 %v5814_v62  ;;  %v5896_v62 = vld [vmem:[#allocation7 + $0x5c4] ss:$28 sps:$4 sm:$0xff]  }
 0x448   :  { %5098 = vmatpush3.bf16.msra.mxu1 %v5818_v63  ;;  %4266 = vmatprep.subr.bf16.mxu0 %v5821_v0  ;;  %v5894_v63 = vld [vmem:[#allocation7 + $0x5c0] ss:$28 sps:$4 sm:$0xff]  }
 0x449   :  { %5099 = vmatprep.subr.bf16.mxu1 %v5822_v18  ;;  %v5899_v0 = vld [vmem:[#allocation7 + $0x5fc] ss:$28 sps:$4 sm:$0xff]  }
 0x44a   :  { %v5897_v18 = vld [vmem:[#allocation7 + $0x5f8] ss:$28 sps:$4 sm:$0xff]  }
 0x44b   :  { %4267 = vmatpush1.bf16.msra.mxu0 %v5819_v2  ;;  %v5902_v2 = vld [vmem:[#allocation7 + $0x634] ss:$28 sps:$4 sm:$0xff]  }
 0x44c   :  { %5100 = vmatpush3.bf16.msra.mxu1 %v5823_v3  ;;  %4268 = vmatprep.subr.bf16.mxu0 %v5826_v4  ;;  %v5900_v3 = vld [vmem:[#allocation7 + $0x630] ss:$28 sps:$4 sm:$0xff]  }
 0x44d   :  { %5107 = vmatprep.subr.bf16.mxu1 %v5827_v6  ;;  %v5905_v4 = vld [vmem:[#allocation7 + $0x66c] ss:$28 sps:$4 sm:$0xff]  }
 0x44e   :  { %v5903_v6 = vld [vmem:[#allocation7 + $0x668] ss:$28 sps:$4 sm:$0xff]  }
 0x44f   :  { %4367 = vmatmul.mubr.bf16.vlgmr.msra.gmra.mrb[24].mxu1 %v6331_v22  ;;  %4269 = vmatpush1.bf16.msra.mxu0 %v5824_v7  ;;  %v5908_v7 = vld [vmem:[#allocation7 + $0x6a4] ss:$28 sps:$4 sm:$0xff]  }
 0x450   :  { %5108 = vmatpush3.bf16.msra.mxu1 %v5828_v8  ;;  %4406 = vmatprep.mubr.bf16.mxu1 %v6335_v26  ;;  %v5906_v8 = vld [vmem:[#allocation7 + $0x6a0] ss:$28 sps:$4 sm:$0xff]  }
 0x451   :  { %4270 = vmatprep.subr.bf16.mxu0 %v5831_v9  ;;  %5109 = vmatprep.subr.bf16.mxu1 %v5832_v10  ;;  %v5911_v9 = vld [vmem:[#allocation7 + $0x6dc] ss:$28 sps:$4 sm:$0xff]  }
 0x452   :  { %v5909_v10 = vld [vmem:[#allocation7 + $0x6d8] ss:$28 sps:$4 sm:$0xff]  }
 0x453   :  { %4271 = vmatpush1.bf16.msra.mxu0 %v5829_v11  ;;  %v6359_v11 = vld [vmem:[%s6407_s11] sm:$0xff] }
 0x454   :  { %5110 = vmatpush3.bf16.msra.mxu1 %v5833_v12  ;;  %4272 = vmatprep.subr.bf16.mxu0 %v5836_v13  ;;  %v2904_v12 = vrot.slane %v6359_v11, %v6242_v54  ;;  %v2912_v13 = vrot.slane %v6359_v11, %v6285_v24 }
 0x455   :  { %5111 = vmatprep.subr.bf16.mxu1 %v5837_v14  ;;  %v2908_v14 = vrot.slane %v6359_v11, %v6248_v56 }
 0x457   :  { %4273 = vmatpush1.bf16.msra.mxu0 %v5834_v15  ;;  %v2916_v15 = vrot.slane %v6359_v11, %v6251_v57 }
 0x458   :  { %5112 = vmatpush3.bf16.msra.mxu1 %v5838_v16  ;;  %4274 = vmatprep.subr.bf16.mxu0 %v5841_v17 }
 0x459   :  { %5113 = vmatprep.subr.bf16.mxu1 %v5842_v20 }
 0x45b   :  { %4275 = vmatpush1.bf16.msra.mxu0 %v5839_v21 }
 0x45c   :  { %5114 = vmatpush3.bf16.msra.mxu1 %v5843_v23  ;;  %4276 = vmatprep.subr.bf16.mxu0 %v5846_v25 }
 0x45d   :  { %5115 = vmatprep.subr.bf16.mxu1 %v5847_v27 }
 0x45f   :  { %4277 = vmatpush1.bf16.msra.mxu0 %v5844_v28 }
 0x460   :  { %5116 = vmatpush3.bf16.msra.mxu1 %v5848_v29  ;;  %4278 = vmatprep.subr.bf16.mxu0 %v5851_v30 }
 0x461   :  { %5117 = vmatprep.subr.bf16.mxu1 %v5852_v31 }
 0x463   :  { %4279 = vmatpush1.bf16.msra.mxu0 %v5849_v32 }
 0x464   :  { %5118 = vmatpush3.bf16.msra.mxu1 %v5853_v33  ;;  %4280 = vmatprep.subr.bf16.mxu0 %v5856_v1 }
 0x465   :  { %5119 = vmatprep.subr.bf16.mxu1 %v5857_v34 }
 0x467   :  { %4281 = vmatpush1.bf16.msra.mxu0 %v5854_v35 }
 0x468   :  { %5120 = vmatpush3.bf16.msra.mxu1 %v5858_v5  ;;  %4282 = vmatprep.subr.bf16.mxu0 %v5861_v37 }
 0x469   :  { %5121 = vmatprep.subr.bf16.mxu1 %v5862_v38 }
 0x46b   :  { %4283 = vmatpush1.bf16.msra.mxu0 %v5859_v39 }
 0x46c   :  { %5122 = vmatpush3.bf16.msra.mxu1 %v5863_v40  ;;  %4293 = vmatprep.subr.bf16.mxu0 %v5866_v41 }
 0x46e   :  { %4285 = vmatmul.mubr.bf16.vlgmr.msra.gmra.mrb[16].mxu0 %v6331_v22  ;;  %v5881_v22 = vld [vmem:[#allocation7 + $0x4ac] ss:$28 sps:$4 sm:$0xff]  }
 0x46f   :  { %4407 = vmatmul.mubr.bf16.vlgmr.msra.gmra.mrb[28].mxu1 %v6344_v36  ;;  %4294 = vmatpush1.bf16.msra.mxu0 %v5864_v42 }
 0x470   :  { %4325 = vmatprep.mubr.bf16.mxu0 %v6335_v26  ;;  %4295 = vmatprep.subr.bf16.mxu0 %v5869_v43  ;;  %v5882_v26 = vld [vmem:[#allocation7 + $0x4e0] ss:$28 sps:$4 sm:$0xff]  }
 0x473   :  { %4296 = vmatpush1.bf16.msra.mxu0 %v5867_v44 }
 0x474   :  { %4297 = vmatprep.subr.bf16.mxu0 %v5872_v45 }
 0x477   :  { %4298 = vmatpush1.bf16.msra.mxu0 %v5870_v46 }
 0x478   :  { %4299 = vmatprep.subr.bf16.mxu0 %v5875_v47 }
 0x47b   :  { %4300 = vmatpush1.bf16.msra.mxu0 %v5873_v48  ;;  %v2927_v48 = vsub.s32 6, %v6239_v53 }
 0x47c   :  { %4301 = vmatprep.subr.bf16.mxu0 %v5878_v49 }
 0x47d   :  { %v2928_v49 = vrot.slane %v6359_v11, %v2927_v48 }
 0x47f   :  { %4302 = vmatpush1.bf16.msra.mxu0 %v5876_v19 }
 0x480   :  { %4303 = vmatprep.subr.bf16.mxu0 %v5881_v22 }
 0x483   :  { %4304 = vmatpush1.bf16.msra.mxu0 %v5879_v50 }
 0x484   :  { %4305 = vmatprep.subr.bf16.mxu0 %v5884_v51 }
 0x487   :  { %4306 = vmatpush1.bf16.msra.mxu0 %v5882_v26 }
 0x488   :  { %4307 = vmatprep.subr.bf16.mxu0 %v5887_v52 }
 0x48b   :  { %4308 = vmatpush1.bf16.msra.mxu0 %v5885_v55 }
 0x48c   :  { %4309 = vmatprep.subr.bf16.mxu0 %v5890_v58 }
 0x48f   :  { %4310 = vmatpush1.bf16.msra.mxu0 %v5888_v59 }
 0x490   :  { %4311 = vmatprep.subr.bf16.mxu0 %v5893_v60 }
 0x493   :  { %4312 = vmatpush1.bf16.msra.mxu0 %v5891_v61 }
 0x494   :  { %4313 = vmatprep.subr.bf16.mxu0 %v5896_v62  ;;  %v2919_v62 = vsub.s32 4, %v6239_v53 }
 0x497   :  { %4314 = vmatpush1.bf16.msra.mxu0 %v5894_v63  ;;  %v2923_v63 = vsub.s32 5, %v6239_v53 }
 0x498   :  { %4315 = vmatprep.subr.bf16.mxu0 %v5899_v0  ;;  %v2920_v0 = vrot.slane %v6359_v11, %v2919_v62 }
 0x49b   :  { %4316 = vmatpush1.bf16.msra.mxu0 %v5897_v18  ;;  %v2924_v18 = vrot.slane %v6359_v11, %v2923_v63 }
 0x49c   :  { %4317 = vmatprep.subr.bf16.mxu0 %v5902_v2 }
 0x49f   :  { %4318 = vmatpush1.bf16.msra.mxu0 %v5900_v3 }
 0x4a0   :  { %4319 = vmatprep.subr.bf16.mxu0 %v5905_v4 }
 0x4a3   :  { %4320 = vmatpush1.bf16.msra.mxu0 %v5903_v6 }
 0x4a4   :  { %4321 = vmatprep.subr.bf16.mxu0 %v5908_v7 }
 0x4a7   :  { %4322 = vmatpush1.bf16.msra.mxu0 %v5906_v8 }
 0x4a8   :  { %4323 = vmatprep.subr.bf16.mxu0 %v5911_v9 }
 0x4ab   :  { %4324 = vmatpush1.bf16.msra.mxu0 %v5909_v10 }
 0x4ae   :  { %4326 = vmatmul.mubr.bf16.vlgmr.msra.gmra.mrb[16].mxu0 %v6344_v36 }
 0x501   :  { %v4163_v16 = vpop.f32.mrb[12].mxu0  ;;  %v4245_v17 = vpop.f32.mrb[20].mxu1 }
 0x502   :  { %v5133_v36 = vadd.f32 %v4163_v16, %v2904_v12  ;;  %v5135_v20 = vadd.f32 %v4245_v17, %v2912_v13  ;;  %v4165_v21 = vpop.f32.mrb[13].mxu0  ;;  %v4247_v23 = vpop.f32.mrb[21].mxu1 }
 0x503   :  { %v5134_v25 = vadd.f32 %v4165_v21, %v2908_v14  ;;  %v5136_v27 = vadd.f32 %v4247_v23, %v2916_v15  ;;  %v4167_v28 = vpop.f32.mrb[14].mxu0  ;;  %v4249_v29 = vpop.f32.mrb[22].mxu1 }
 0x504   :  { %v4990_v54 = vmul.f32 -1.442695, %v5133_v36  ;;  %v4992_v30 = vmul.f32 -1.442695, %v5135_v20  ;;  %v4168_v31 = vpop.f32.mrb[15].mxu0  ;;  %v4250_v24 = vpop.f32.mrb[23].mxu1 }
 0x505   :  { %v4991_v32 = vmul.f32 -1.442695, %v5134_v25  ;;  %v4993_v33 = vmul.f32 -1.442695, %v5136_v27 }
 0x506   :  { %5912 = vpow2.f32 %v4990_v54 }
 0x507   :  { %5914 = vpow2.f32 %v4992_v30 }
 0x508   :  { %5916 = vpow2.f32 %v4991_v32 }
 0x509   :  { %5918 = vpow2.f32 %v4993_v33 }
 0x510   :  { %v5913_v56 = vpop.eup %5912 }
 0x511   :  { %v5915_v57 = vpop.eup %5914  ;;  %v4435_v1 = vadd.f32 1.0, %v5913_v56 }
 0x512   :  { %v5917_v34 = vpop.eup %5916  ;;  %v4437_v35 = vadd.f32 1.0, %v5915_v57 }
 0x513   :  { %v5919_v5 = vpop.eup %5918  ;;  %5920 = vrcp.f32 %v4435_v1  ;;  %v4436_v37 = vadd.f32 1.0, %v5917_v34 }
 0x514   :  { %5922 = vrcp.f32 %v4437_v35  ;;  %v4438_v38 = vadd.f32 1.0, %v5919_v5 }
 0x515   :  { %5924 = vrcp.f32 %v4436_v37 }
 0x516   :  { %5926 = vrcp.f32 %v4438_v38 }
 0x51d   :  { %v5921_v39 = vpop.eup %5920 }
 0x51e   :  { %v5923_v40 = vpop.eup %5922  ;;  %4456 = vst [vmem:[%s6408_s12] sm:$0xff] %v5921_v39 }
 0x51f   :  { %v5925_v41 = vpop.eup %5924  ;;  %4458 = vst [vmem:[%s6408_s12 + $0x10] sm:$0xff] %v5923_v40 }
 0x520   :  { %v5927_v42 = vpop.eup %5926  ;;  %4457 = vst [vmem:[%s6408_s12 + $0x8] sm:$0xff] %v5925_v41 }
 0x521   :  { %4459 = vst [vmem:[%s6408_s12 + $0x18] sm:$0xff] %v5927_v42 }
 0x522   :  { %v5101_v43 = vpop.f32.mrb[24].mxu1 }
 0x523   :  { %v5102_v44 = vpop.f32.mrb[25].mxu1 }
 0x524   :  { %v5103_v45 = vadd.f32 %v5102_v44, %v5101_v43  ;;  %v5104_v46 = vpop.f32.mrb[26].mxu1 }
 0x525   :  { %v5105_v47 = vpop.f32.mrb[27].mxu1 }
 0x526   :  { %v4369_v50 = vadd.f32 %v5103_v45, %v2928_v49 }
 0x542   :  { %v5123_v19 = vpop.f32.mrb[28].mxu1 }
 0x543   :  { %v5124_v22 = vpop.f32.mrb[29].mxu1 }
 0x544   :  { %v5125_v51 = vadd.f32 %v5124_v22, %v5123_v19  ;;  %v5126_v26 = vpop.f32.mrb[30].mxu1 }
 0x545   :  { %v5127_v52 = vpop.f32.mrb[31].mxu1 }
 0x546   :  { %v4409_v55 = vadd.f32 %v5125_v51, %v4369_v50 }
 0x548   :  { %v4996_v58 = vmul.f32 -1.442695, %v4409_v55 }
 0x54a   :  { %5928 = vpow2.f32 %v4996_v58 }
 0x554   :  { %v5929_v59 = vpop.eup %5928 }
 0x555   :  { %v4441_v60 = vadd.f32 1.0, %v5929_v59 }
 0x557   :  { %5930 = vrcp.f32 %v4441_v60 }
 0x561   :  { %v5931_v61 = vpop.eup %5930 }
 0x562   :  { %4462 = vst [vmem:[%s6408_s12 + $0x30] sm:$0xff] %v5931_v61 }
 0x581   :  { %v4327_v2 = vpop.f32.mrb[16].mxu0 }
 0x582   :  { %v5137_v3 = vadd.f32 %v4327_v2, %v2920_v0  ;;  %v4329_v4 = vpop.f32.mrb[17].mxu0 }
 0x583   :  { %v5138_v6 = vadd.f32 %v4329_v4, %v2924_v18  ;;  %v4331_v7 = vpop.f32.mrb[18].mxu0 }
 0x584   :  { %v4994_v8 = vmul.f32 -1.442695, %v5137_v3  ;;  %v4332_v9 = vpop.f32.mrb[19].mxu0 }
 0x585   :  { %v4995_v10 = vmul.f32 -1.442695, %v5138_v6 }
 0x586   :  { %5932 = vpow2.f32 %v4994_v8 }
 0x587   :  { %5934 = vpow2.f32 %v4995_v10 }
 0x590   :  { %v5933_v12 = vpop.eup %5932 }
 0x591   :  { %v5935_v13 = vpop.eup %5934  ;;  %v4439_v14 = vadd.f32 1.0, %v5933_v12 }
 0x592   :  { %v4440_v15 = vadd.f32 1.0, %v5935_v13 }
 0x593   :  { %5936 = vrcp.f32 %v4439_v14 }
 0x594   :  { %5938 = vrcp.f32 %v4440_v15 }
 0x59d   :  { %v5937_v53 = vpop.eup %5936 }
 0x59e   :  { %v5939_v16 = vpop.eup %5938  ;;  %4460 = vst [vmem:[%s6408_s12 + $0x20] sm:$0xff] %v5937_v53 }
 0x59f   :  { %4461 = vst [vmem:[%s6408_s12 + $0x28] sm:$0xff] %v5939_v16 }
 0x5a0   :  { %4467 = vsyncpa [#allocation3], 1 }
 0x5a1   :  { %4468 = vsyncpa [#allocation5], 1 }
 0x5a2   :  { %4469 = vsyncpa [#allocation8], 1 }

</bundles_post_ra>
